<compile_context>
chip_gen: v6e
topology: v6e:2x2x1
jax: 0.10.0
libtpu: 0.0.40
codegen_flags: <defaults>
</compile_context>

<pallas_src>
import jax
import jax.numpy as jnp
from jax.experimental import pallas as pl
from jax.experimental.pallas import tpu as pltpu

HIDDEN = 1024
LANE = 128
SUBLANE_BF16 = 16  # bf16 packs 16 rows per vreg sublane group


def _round_up(n, m):
    return ((n + m - 1) // m) * m


def net3_kernel(x_ref, w1_ref, shift_ref, w2_ref, b2_ref, o_ref):
    # Hidden layer: Linear with BatchNorm folded into W1/shift.  Dropout is
    # identity in eval mode.  Bias add + ReLU in f32.
    h = jnp.dot(x_ref[...], w1_ref[...], preferred_element_type=jnp.float32)
    h = jnp.maximum(h + shift_ref[...], 0.0)
    # Output layer: lane-dense (padded-to-128) N; bf16 store halves writeback.
    out = jnp.dot(h.astype(w2_ref.dtype), w2_ref[...],
                  preferred_element_type=jnp.float32)
    o_ref[...] = (out + b2_ref[...]).astype(o_ref.dtype)


def prepare_params(params, eps=1e-5):
    """One-time parameter prep (hoisted out of the per-call path).

    Folds BatchNorm1d (eval / running stats) into the first Linear:
        bn(x@W1 + b1) == x @ (W1 * scale) + (b1 * scale + shift)
    and pads/casts weights to MXU/lane-friendly bf16 tiles.
    """
    w1, b1, gamma, beta, run_mean, run_var, w2, b2 = params
    input_dim, hidden = w1.shape
    hidden2, num_classes = w2.shape
    assert hidden == HIDDEN and hidden2 == HIDDEN

    scale = gamma * jax.lax.rsqrt(run_var + eps)
    shift = beta - run_mean * scale
    w1f = w1 * scale[None, :]
    shiftf = b1 * scale + shift

    k_pad = _round_up(input_dim, LANE)
    n_pad = _round_up(num_classes, LANE)

    w1_p = jnp.zeros((k_pad, hidden), jnp.bfloat16).at[:input_dim, :].set(
        w1f.astype(jnp.bfloat16))
    w2_p = jnp.zeros((hidden, n_pad), jnp.bfloat16).at[:, :num_classes].set(
        w2.astype(jnp.bfloat16))
    b2_p = jnp.zeros((1, n_pad), jnp.float32).at[0, :num_classes].set(
        b2.astype(jnp.float32))
    shift_p = shiftf.reshape(1, hidden).astype(jnp.float32)

    return dict(w1_p=w1_p, shift_p=shift_p, w2_p=w2_p, b2_p=b2_p,
                input_dim=int(input_dim), num_classes=int(num_classes),
                k_pad=int(k_pad), n_pad=int(n_pad), hidden=int(hidden))


def _pick_tile_b(batch, tile_b_max):
    """Adaptive batch tile.

    - Pad only to the bf16 sublane multiple (16) for tiny batches.
    - Cap at tile_b_max (default 512) for large batches.
    - Keep >=2 grid steps whenever the batch allows so the "parallel" axis
      can shard across the 2 TensorCores of a v7x chip.
    """
    b16 = _round_up(max(batch, 1), SUBLANE_BF16)
    n_groups = b16 // SUBLANE_BF16
    groups_per_tile = min(max(tile_b_max // SUBLANE_BF16, 1),
                          max((n_groups + 1) // 2, 1))
    return SUBLANE_BF16 * groups_per_tile


def net3_forward(x, prepared, *, tile_b=512):
    """x: (B, input_dim) f32.  Returns (B, num_classes) f32."""
    B, input_dim = x.shape
    assert input_dim == prepared["input_dim"]
    num_classes = prepared["num_classes"]
    k_pad = prepared["k_pad"]
    n_pad = prepared["n_pad"]
    hidden = prepared["hidden"]

    tile_b = _pick_tile_b(B, tile_b)
    b_pad = _round_up(B, tile_b)
    grid = (b_pad // tile_b,)

    # Per-call input prep: only x is padded / cast.
    x_bf16 = x.astype(jnp.bfloat16)
    if b_pad == B and k_pad == input_dim:
        x_p = x_bf16
    else:
        x_p = jnp.zeros((b_pad, k_pad), jnp.bfloat16).at[:B, :input_dim].set(x_bf16)

    # Cost estimate from the *real* problem size (not padded shapes) so XLA's
    # scheduling around the custom call is not skewed by padding.
    flops = 2 * B * (input_dim * hidden + hidden * num_classes)
    bytes_accessed = (B * input_dim * 2 + input_dim * hidden * 2
                      + hidden * num_classes * 2 + hidden * 4
                      + num_classes * 4 + B * num_classes * 2)

    def run(single_buffer_weights):
        # Weights/biases have constant index_maps -> VMEM-resident.  Single
        # buffering avoids wasting a second VMEM copy on them.
        resident = ({"pipeline_mode": pl.Buffered(1)}
                    if single_buffer_weights else {})
        return pl.pallas_call(
            net3_kernel,
            out_shape=jax.ShapeDtypeStruct((b_pad, n_pad), jnp.bfloat16),
            grid_spec=pltpu.PrefetchScalarGridSpec(
                num_scalar_prefetch=0,
                grid=grid,
                in_specs=[
                    pl.BlockSpec((tile_b, k_pad), lambda i: (i, 0)),            # x tile
                    pl.BlockSpec((k_pad, hidden), lambda i: (0, 0), **resident),  # W1
                    pl.BlockSpec((1, hidden), lambda i: (0, 0), **resident),      # shift
                    pl.BlockSpec((hidden, n_pad), lambda i: (0, 0), **resident),  # W2
                    pl.BlockSpec((1, n_pad), lambda i: (0, 0), **resident),       # b2
                ],
                out_specs=pl.BlockSpec((tile_b, n_pad), lambda i: (i, 0)),
            ),
            compiler_params=pltpu.CompilerParams(
                dimension_semantics=("parallel",)),
            cost_estimate=pl.CostEstimate(
                flops=flops, transcendentals=0, bytes_accessed=bytes_accessed),
        )(x_p, prepared["w1_p"], prepared["shift_p"],
          prepared["w2_p"], prepared["b2_p"])

    try:
        out_p = run(True)
    except Exception:
        # Fallback for jax versions where pipeline_mode=pl.Buffered(1) is not
        # supported on pallas_call inputs; default double-buffering is
        # functionally identical.
        out_p = run(False)

    return out_p[:B, :num_classes].astype(jnp.float32)


def init_params(key, input_dim, num_classes, hidden=HIDDEN):
    # Deterministic init mimicking PyTorch nn.Linear defaults:
    # U(-1/sqrt(fan_in), 1/sqrt(fan_in)) for weights and biases.
    k1, k2, k3, k4 = jax.random.split(key, 4)
    bound1 = 1.0 / jnp.sqrt(jnp.float32(input_dim))
    w1 = jax.random.uniform(k1, (input_dim, hidden), jnp.float32, -bound1, bound1)
    b1 = jax.random.uniform(k2, (hidden,), jnp.float32, -bound1, bound1)
    # BatchNorm1d(1024): gamma=1, beta=0, running_mean=0, running_var=1
    gamma = jnp.ones((hidden,), jnp.float32)
    beta = jnp.zeros((hidden,), jnp.float32)
    run_mean = jnp.zeros((hidden,), jnp.float32)
    run_var = jnp.ones((hidden,), jnp.float32)
    bound2 = 1.0 / jnp.sqrt(jnp.float32(hidden))
    w2 = jax.random.uniform(k3, (hidden, num_classes), jnp.float32, -bound2, bound2)
    b2 = jax.random.uniform(k4, (num_classes,), jnp.float32, -bound2, bound2)
    return (w1, b1, gamma, beta, run_mean, run_var, w2, b2)


if __name__ == "__main__":
    key = jax.random.PRNGKey(0)
    k_param, k_x = jax.random.split(key)

    B, INPUT_DIM, NUM_CLASSES = 8, 32, 10
    params = init_params(k_param, INPUT_DIM, NUM_CLASSES)
    prepared = prepare_params(params)          # one-time prep (hoisted out of forward)
    x = jax.random.normal(k_x, (B, INPUT_DIM), jnp.float32)

    out = net3_forward(x, prepared)
    out = jax.block_until_ready(out)
    assert out.shape == (B, NUM_CLASSES)

    # Reference with the same bf16 MXU inputs / f32 accumulation (tight check;
    # tolerance allows the kernel's bf16 output store).
    w1, b1, gamma, beta, rm, rv, w2, b2 = params
    scale = gamma / jnp.sqrt(rv + 1e-5)
    shift = beta - rm * scale
    h = jnp.dot(x.astype(jnp.bfloat16), (w1 * scale[None, :]).astype(jnp.bfloat16),
                preferred_element_type=jnp.float32) + (b1 * scale + shift)
    h = jnp.maximum(h, 0.0)
    ref_bf16 = jnp.dot(h.astype(jnp.bfloat16), w2.astype(jnp.bfloat16),
                       preferred_element_type=jnp.float32) + b2
    assert jnp.allclose(out, ref_bf16, atol=2e-2, rtol=2e-2)

    # Full-precision reference of the module's forward (looser tolerance).
    hf = jnp.maximum(gamma * (x @ w1 + b1 - rm) / jnp.sqrt(rv + 1e-5) + beta, 0.0)
    ref_f32 = hf @ w2 + b2
    assert jnp.allclose(out, ref_f32, atol=5e-2, rtol=5e-2)

    print("KERNEL_OK")
</pallas_src>

<mosaic_0001>
module attributes {stable_mosaic.version = 11 : i64} {
  func.func @net3_kernel(%arg0: i32, %arg1: memref<16x128xbf16, #tpu.memory_space<vmem>>, %arg2: memref<128x1024xbf16, #tpu.memory_space<vmem>>, %arg3: memref<1x1024xf32, #tpu.memory_space<vmem>>, %arg4: memref<1024x128xbf16, #tpu.memory_space<vmem>>, %arg5: memref<1x128xf32, #tpu.memory_space<vmem>>, %arg6: memref<16x128xbf16, #tpu.memory_space<vmem>>) attributes {dimension_semantics = [#tpu.dimension_semantics<parallel>], iteration_bounds = array<i64: 1>, scalar_prefetch = 0 : i64, scratch_operands = 0 : i64, tpu.core_type = #tpu.core_type<tc>, window_params = [{transform_indices = @transform_0, window_bounds = array<i64: 16, 128>}, {pipeline_mode = #tpu.pipeline_mode<synchronous>, transform_indices = @transform_1, window_bounds = array<i64: 128, 1024>}, {pipeline_mode = #tpu.pipeline_mode<synchronous>, transform_indices = @transform_2, window_bounds = array<i64: 1, 1024>}, {pipeline_mode = #tpu.pipeline_mode<synchronous>, transform_indices = @transform_3, window_bounds = array<i64: 1024, 128>}, {pipeline_mode = #tpu.pipeline_mode<synchronous>, transform_indices = @transform_4, window_bounds = array<i64: 1, 128>}, {transform_indices = @transform_5, window_bounds = array<i64: 16, 128>}]} {
    %c0 = arith.constant 0 : index
    %c0_0 = arith.constant 0 : index
    %0 = vector.load %arg1[%c0, %c0_0] : memref<16x128xbf16, #tpu.memory_space<vmem>>, vector<16x128xbf16>
    %c0_1 = arith.constant 0 : index
    %c0_2 = arith.constant 0 : index
    %1 = vector.load %arg2[%c0_1, %c0_2] : memref<128x1024xbf16, #tpu.memory_space<vmem>>, vector<128x1024xbf16>
    %cst = arith.constant dense<0.000000e+00> : vector<16x1024xf32>
    %2 = tpu.matmul %0, %1, %cst {dimension_numbers = #tpu.dot_dimension_numbers<[1], [0], [0], [1], [0, 0, 1, 1], [], []>} : vector<16x128xbf16>, vector<128x1024xbf16>, vector<16x1024xf32> -> vector<16x1024xf32>
    %c0_3 = arith.constant 0 : index
    %c0_4 = arith.constant 0 : index
    %3 = vector.load %arg3[%c0_3, %c0_4] : memref<1x1024xf32, #tpu.memory_space<vmem>>, vector<1x1024xf32>
    %4 = vector.broadcast %3 : vector<1x1024xf32> to vector<16x1024xf32>
    %5 = arith.addf %2, %4 : vector<16x1024xf32>
    %cst_5 = arith.constant 0.000000e+00 : f32
    %6 = vector.broadcast %cst_5 : f32 to vector<16x1024xf32>
    %7 = arith.maximumf %5, %6 : vector<16x1024xf32>
    %8 = arith.truncf %7 : vector<16x1024xf32> to vector<16x1024xbf16>
    %c0_6 = arith.constant 0 : index
    %c0_7 = arith.constant 0 : index
    %9 = vector.load %arg4[%c0_6, %c0_7] : memref<1024x128xbf16, #tpu.memory_space<vmem>>, vector<1024x128xbf16>
    %cst_8 = arith.constant dense<0.000000e+00> : vector<16x128xf32>
    %10 = tpu.matmul %8, %9, %cst_8 {dimension_numbers = #tpu.dot_dimension_numbers<[1], [0], [0], [1], [0, 0, 1, 1], [], []>} : vector<16x1024xbf16>, vector<1024x128xbf16>, vector<16x128xf32> -> vector<16x128xf32>
    %c0_9 = arith.constant 0 : index
    %c0_10 = arith.constant 0 : index
    %11 = vector.load %arg5[%c0_9, %c0_10] : memref<1x128xf32, #tpu.memory_space<vmem>>, vector<1x128xf32>
    %12 = vector.broadcast %11 : vector<1x128xf32> to vector<16x128xf32>
    %13 = arith.addf %10, %12 : vector<16x128xf32>
    %14 = arith.truncf %13 : vector<16x128xf32> to vector<16x128xbf16>
    %c0_11 = arith.constant 0 : index
    %c0_12 = arith.constant 0 : index
    %15 = vector.load %arg6[%c0_11, %c0_12] : memref<16x128xbf16, #tpu.memory_space<vmem>>, vector<16x128xbf16>
    tpu.vector_store %arg6[%c0_11, %c0_12], %14 {strides = array<i32>} : memref<16x128xbf16, #tpu.memory_space<vmem>>, vector<16x128xbf16>,
    return
  }
  func.func @transform_0(%arg0: i32) -> (i32, i32) {
    %c0_i32 = arith.constant 0 : i32
    %c0_i32_0 = arith.constant 0 : i32
    return %arg0, %c0_i32 : i32, i32
  }
  func.func @transform_1(%arg0: i32) -> (i32, i32) {
    %c0_i32 = arith.constant 0 : i32
    %c0_i32_0 = arith.constant 0 : i32
    %c0_i32_1 = arith.constant 0 : i32
    return %c0_i32, %c0_i32_0 : i32, i32
  }
  func.func @transform_2(%arg0: i32) -> (i32, i32) {
    %c0_i32 = arith.constant 0 : i32
    %c0_i32_0 = arith.constant 0 : i32
    %c0_i32_1 = arith.constant 0 : i32
    return %c0_i32, %c0_i32_0 : i32, i32
  }
  func.func @transform_3(%arg0: i32) -> (i32, i32) {
    %c0_i32 = arith.constant 0 : i32
    %c0_i32_0 = arith.constant 0 : i32
    %c0_i32_1 = arith.constant 0 : i32
    return %c0_i32, %c0_i32_0 : i32, i32
  }
  func.func @transform_4(%arg0: i32) -> (i32, i32) {
    %c0_i32 = arith.constant 0 : i32
    %c0_i32_0 = arith.constant 0 : i32
    %c0_i32_1 = arith.constant 0 : i32
    return %c0_i32, %c0_i32_0 : i32, i32
  }
  func.func @transform_5(%arg0: i32) -> (i32, i32) {
    %c0_i32 = arith.constant 0 : i32
    %c0_i32_0 = arith.constant 0 : i32
    return %arg0, %c0_i32 : i32, i32
  }
}

module attributes {stable_mosaic.version = 11 : i64} {
  func.func @net3_kernel(%arg0: i32, %arg1: memref<16x128xbf16, #tpu.memory_space<vmem>>, %arg2: memref<128x1024xbf16, #tpu.memory_space<vmem>>, %arg3: memref<1x1024xf32, #tpu.memory_space<vmem>>, %arg4: memref<1024x128xbf16, #tpu.memory_space<vmem>>, %arg5: memref<1x128xf32, #tpu.memory_space<vmem>>, %arg6: memref<16x128xbf16, #tpu.memory_space<vmem>>) attributes {dimension_semantics = [#tpu.dimension_semantics<parallel>], iteration_bounds = array<i64: 1>, scalar_prefetch = 0 : i64, scratch_operands = 0 : i64, tpu.core_type = #tpu.core_type<tc>, window_params = [{transform_indices = @transform_0, window_bounds = array<i64: 16, 128>}, {pipeline_mode = #tpu.pipeline_mode<synchronous>, transform_indices = @transform_1, window_bounds = array<i64: 128, 1024>}, {pipeline_mode = #tpu.pipeline_mode<synchronous>, transform_indices = @transform_2, window_bounds = array<i64: 1, 1024>}, {pipeline_mode = #tpu.pipeline_mode<synchronous>, transform_indices = @transform_3, window_bounds = array<i64: 1024, 128>}, {pipeline_mode = #tpu.pipeline_mode<synchronous>, transform_indices = @transform_4, window_bounds = array<i64: 1, 128>}, {transform_indices = @transform_5, window_bounds = array<i64: 16, 128>}]} {
    %c0 = arith.constant 0 : index
    %c0_0 = arith.constant 0 : index
    %0 = vector.load %arg1[%c0, %c0_0] : memref<16x128xbf16, #tpu.memory_space<vmem>>, vector<16x128xbf16>
    %c0_1 = arith.constant 0 : index
    %c0_2 = arith.constant 0 : index
    %1 = vector.load %arg2[%c0_1, %c0_2] : memref<128x1024xbf16, #tpu.memory_space<vmem>>, vector<128x1024xbf16>
    %cst = arith.constant dense<0.000000e+00> : vector<16x1024xf32>
    %2 = tpu.matmul %0, %1, %cst {dimension_numbers = #tpu.dot_dimension_numbers<[1], [0], [0], [1], [0, 0, 1, 1], [], []>} : vector<16x128xbf16>, vector<128x1024xbf16>, vector<16x1024xf32> -> vector<16x1024xf32>
    %c0_3 = arith.constant 0 : index
    %c0_4 = arith.constant 0 : index
    %3 = vector.load %arg3[%c0_3, %c0_4] : memref<1x1024xf32, #tpu.memory_space<vmem>>, vector<1x1024xf32>
    %4 = vector.broadcast %3 : vector<1x1024xf32> to vector<16x1024xf32>
    %5 = arith.addf %2, %4 : vector<16x1024xf32>
    %cst_5 = arith.constant 0.000000e+00 : f32
    %6 = vector.broadcast %cst_5 : f32 to vector<16x1024xf32>
    %7 = arith.maximumf %5, %6 : vector<16x1024xf32>
    %8 = arith.truncf %7 : vector<16x1024xf32> to vector<16x1024xbf16>
    %c0_6 = arith.constant 0 : index
    %c0_7 = arith.constant 0 : index
    %9 = vector.load %arg4[%c0_6, %c0_7] : memref<1024x128xbf16, #tpu.memory_space<vmem>>, vector<1024x128xbf16>
    %cst_8 = arith.constant dense<0.000000e+00> : vector<16x128xf32>
    %10 = tpu.matmul %8, %9, %cst_8 {dimension_numbers = #tpu.dot_dimension_numbers<[1], [0], [0], [1], [0, 0, 1, 1], [], []>} : vector<16x1024xbf16>, vector<1024x128xbf16>, vector<16x128xf32> -> vector<16x128xf32>
    %c0_9 = arith.constant 0 : index
    %c0_10 = arith.constant 0 : index
    %11 = vector.load %arg5[%c0_9, %c0_10] : memref<1x128xf32, #tpu.memory_space<vmem>>, vector<1x128xf32>
    %12 = vector.broadcast %11 : vector<1x128xf32> to vector<16x128xf32>
    %13 = arith.addf %10, %12 : vector<16x128xf32>
    %14 = arith.truncf %13 : vector<16x128xf32> to vector<16x128xbf16>
    %c0_11 = arith.constant 0 : index
    %c0_12 = arith.constant 0 : index
    %15 = vector.load %arg6[%c0_11, %c0_12] : memref<16x128xbf16, #tpu.memory_space<vmem>>, vector<16x128xbf16>
    tpu.vector_store %arg6[%c0_11, %c0_12], %14 {strides = array<i32>} : memref<16x128xbf16, #tpu.memory_space<vmem>>, vector<16x128xbf16>,
    return
  }
  func.func @transform_0(%arg0: i32) -> (i32, i32) {
    %c0_i32 = arith.constant 0 : i32
    %c0_i32_0 = arith.constant 0 : i32
    return %arg0, %c0_i32 : i32, i32
  }
  func.func @transform_1(%arg0: i32) -> (i32, i32) {
    %c0_i32 = arith.constant 0 : i32
    %c0_i32_0 = arith.constant 0 : i32
    %c0_i32_1 = arith.constant 0 : i32
    return %c0_i32, %c0_i32_0 : i32, i32
  }
  func.func @transform_2(%arg0: i32) -> (i32, i32) {
    %c0_i32 = arith.constant 0 : i32
    %c0_i32_0 = arith.constant 0 : i32
    %c0_i32_1 = arith.constant 0 : i32
    return %c0_i32, %c0_i32_0 : i32, i32
  }
  func.func @transform_3(%arg0: i32) -> (i32, i32) {
    %c0_i32 = arith.constant 0 : i32
    %c0_i32_0 = arith.constant 0 : i32
    %c0_i32_1 = arith.constant 0 : i32
    return %c0_i32, %c0_i32_0 : i32, i32
  }
  func.func @transform_4(%arg0: i32) -> (i32, i32) {
    %c0_i32 = arith.constant 0 : i32
    %c0_i32_0 = arith.constant 0 : i32
    %c0_i32_1 = arith.constant 0 : i32
    return %c0_i32, %c0_i32_0 : i32, i32
  }
  func.func @transform_5(%arg0: i32) -> (i32, i32) {
    %c0_i32 = arith.constant 0 : i32
    %c0_i32_0 = arith.constant 0 : i32
    return %arg0, %c0_i32 : i32, i32
  }
}

</mosaic_0001>

<bundles_post_ra>
// kernel: tpu_custom_call.1
= control target key start
LH: loop header
LB: loop body
LE: loop exit
PB: predicated region body
PF: predicated region fallthrough
CT: control target
= control target key end

     0   :  { %10 = vsyncpa [#allocation3], 0  ;;  %s1924_s0 = inlined_call_operand.hbm [shape: bf16[16,128], index: 0, kind: input, shape index: {}]   ;;  %s1925_s1 = inlined_call_operand.hbm [shape: bf16[128,1024], index: 1, kind: input, shape index: {}]   ;;  %s1926_s2 = inlined_call_operand.hbm [shape: f32[1,1024], index: 2, kind: input, shape index: {}]   ;;  %s1927_s3 = inlined_call_operand.hbm [shape: bf16[1024,128], index: 3, kind: input, shape index: {}]   ;;  %s1928_s4 = inlined_call_operand.vmem [shape: f32[1,128], index: 4, kind: input, shape index: {}]   ;;  %s1929_s5 = inlined_call_operand.hbm [shape: bf16[16,128], index: 5, kind: output, shape index: {}]  }
   0x1   :  { %11 = vsyncpa [#allocation6], 0 }
   0x2   :  { %12 = vsyncpa [#allocation9], 0 }
   0x3   :  { %13 = vsyncpa [#allocation4], 0  ;;  %s1827_s18 = smov [#allocation5]  }
   0x4   :  { %s31_s19 = sshll.u32 %s1827_s18, 4  ;;  %s32_s19 = int_to_ptr.vmem [resolvable:$true] %s31_s19 }
   0x5   :  { %s1727_s20 = scalar_lea.vmem %s32_s19, 8192  ;;  %p1732_p1 = scmp.lt.s32.totalorder %s32_s19, %s32_s19 }
   0x6   :  { %p1728_p0 = scmp.ne.s32.totalorder %s32_s19, %s1727_s20  ;;  %p1733_p2 = scmp.lt.s32.totalorder %s1727_s20, %s1727_s20 }
   0x8   :  { %p1734_p3 = por %p1733_p2, %p1732_p1 }
   0xa   :  { %p1735_p4 = pnand %p1734_p3, %p1728_p0 }
   0xc   :  { %1738 = shalt.err (!%p1735_p4)
}
   0xd   :  { %s1828_s21 = smov 512   ;;  %s1829_s22 = smov 32  }
   0xe   :  { %37 = dma.hbm_to_vmem [thread:$0]  %s1925_s1, 8192, %s32_s19, [#allocation6], %s1828_s21, %s1828_s21, %s1829_s22  }
   0xf   :  { %s1830_s25 = smov [#allocation2]  }
  0x10   :  { %s19_s26 = sshll.u32 %s1830_s25, 4  ;;  %s20_s26 = int_to_ptr.vmem [resolvable:$true] %s19_s26 }
  0x11   :  { %s1747_s27 = scalar_lea.vmem %s20_s26, 128  ;;  %p1752_p6 = scmp.lt.s32.totalorder %s20_s26, %s20_s26 }
  0x12   :  { %p1748_p5 = scmp.ne.s32.totalorder %s20_s26, %s1747_s27  ;;  %p1753_p7 = scmp.lt.s32.totalorder %s1747_s27, %s1747_s27 }
  0x14   :  { %p1754_p8 = por %p1753_p7, %p1752_p6 }
  0x16   :  { %p1755_p9 = pnand %p1754_p8, %p1748_p5 }
  0x18   :  { %1758 = shalt.err (!%p1755_p9)
}
  0x19   :  { %s1831_s28 = smov 64   ;;  %s1832_s29 = smov 4  }
  0x1a   :  { %25 = dma.hbm_to_vmem [thread:$0]  %s1924_s0, 128, %s20_s26, [#allocation3], %s1831_s28, %s1831_s28, %s1832_s29  }
  0x1b   :  { %s1833_s1 = smov [#allocation7]   ;;  %s1834_s8 = smov [#allocation8]  }
  0x1c   :  { %s44_s7 = sshll.u32 %s1833_s1, 4  ;;  %s53_s9 = sshll.u32 %s1834_s8, 4  ;;  %s45_s7 = int_to_ptr.vmem [resolvable:$true] %s44_s7  ;;  %s54_s9 = int_to_ptr.vmem [resolvable:$true] %s53_s9 }
  0x1d   :  { %s1767_s10 = scalar_lea.vmem %s45_s7, 128  ;;  %p1772_p11 = scmp.lt.s32.totalorder %s45_s7, %s45_s7 }
  0x1e   :  { %p1768_p10 = scmp.ne.s32.totalorder %s45_s7, %s1767_s10  ;;  %p1773_p12 = scmp.lt.s32.totalorder %s1767_s10, %s1767_s10 }
  0x20   :  { %p1774_p13 = por %p1773_p12, %p1772_p11 }
  0x22   :  { %p1775_p0 = pnand %p1774_p13, %p1768_p10 }
  0x24   :  { %1778 = shalt.err (!%p1775_p0)
}
  0x25   :  { %47 = dma.hbm_to_vmem [thread:$0]  %s1926_s2, 128, %s45_s7, [#allocation6]  }
  0x26   :  { %s1787_s13 = scalar_lea.vmem %s54_s9, 8192  ;;  %p1792_p2 = scmp.lt.s32.totalorder %s54_s9, %s54_s9 }
  0x27   :  { %p1788_p1 = scmp.ne.s32.totalorder %s54_s9, %s1787_s13  ;;  %p1793_p3 = scmp.lt.s32.totalorder %s1787_s13, %s1787_s13 }
  0x29   :  { %p1794_p4 = por %p1793_p3, %p1792_p2 }
  0x2b   :  { %p1795_p5 = pnand %p1794_p4, %p1788_p1 }
  0x2d   :  { %1798 = shalt.err (!%p1795_p5)
}
  0x2e   :  { %59 = dma.hbm_to_vmem [thread:$0]  %s1927_s3, 8192, %s54_s9, [#allocation9], %s1831_s28, %s1831_s28, %s1832_s29  }
  0x2f   :  { %1819 = dma.done.wait [#allocation3], 128  }
  0x30   :  { %1820 = vsyncadd [#allocation3], 4294967168 }
  0x31   :  { %1821 = dma.done.wait [#allocation6], 8320  }
  0x32   :  { %1822 = vsyncadd [#allocation6], 4294958976 }
  0x33   :  { %1823 = dma.done.wait [#allocation9], 8192  }
  0x34   :  { %1824 = vsyncadd [#allocation9], 4294959104  ;;  %v1835_v0 = vmov 0   ;;  %v133_v1 = vld [vmem:[#allocation5 + $0x1c0] sm:$0xff]  ;;  %v134_v3 = vld [vmem:[#allocation5 + $0x1c8] sm:$0xff] }
  0x35   :  { %541 = vmatprep.mubr.bf16.mxu0 %v1835_v0  ;;  %584 = vmatprep.mubr.bf16.mxu1 %v1835_v0  ;;  %v137_v2 = vld [vmem:[#allocation5 + $0x1e0] sm:$0xff]  ;;  %v138_v5 = vld [vmem:[#allocation5 + $0x1e8] sm:$0xff]  ;;  %v135_v60 = vld [vmem:[#allocation5 + $0x1d0] sm:$0xff] }
  0x36   :  { %v1475_v4 = vcombine.high %v133_v1, %v137_v2  ;;  %v1474_v6 = vcombine.low %v133_v1, %v137_v2  ;;  %v125_v7 = vld [vmem:[#allocation5 + $0x180] sm:$0xff]  ;;  %v1477_v9 = vcombine.high %v134_v3, %v138_v5  ;;  %v1476_v10 = vcombine.low %v134_v3, %v138_v5  ;;  %v126_v12 = vld [vmem:[#allocation5 + $0x188] sm:$0xff]  ;;  %v139_v63 = vld [vmem:[#allocation5 + $0x1f0] sm:$0xff] }
  0x37   :  { %v129_v8 = vld [vmem:[#allocation5 + $0x1a0] sm:$0xff]  ;;  %v130_v13 = vld [vmem:[#allocation5 + $0x1a8] sm:$0xff]  ;;  %v136_v2 = vld [vmem:[#allocation5 + $0x1d8] sm:$0xff] }
  0x38   :  { %v1467_v11 = vcombine.high %v125_v7, %v129_v8  ;;  %v117_v14 = vld [vmem:[#allocation5 + $0x140] sm:$0xff]  ;;  %509 = vmatprep.subr.bf16.mxu0 %v1475_v4  ;;  %v1469_v15 = vcombine.high %v126_v12, %v130_v13  ;;  %v118_v17 = vld [vmem:[#allocation5 + $0x148] sm:$0xff]  ;;  %552 = vmatprep.subr.bf16.mxu1 %v1477_v9  ;;  %v1466_v19 = vcombine.low %v125_v7, %v129_v8  ;;  %v140_v3 = vld [vmem:[#allocation5 + $0x1f8] sm:$0xff] }
  0x39   :  { %v121_v16 = vld [vmem:[#allocation5 + $0x160] sm:$0xff]  ;;  %v122_v18 = vld [vmem:[#allocation5 + $0x168] sm:$0xff]  ;;  %510 = vmatpush1.bf16.msra.mxu0 %v1474_v6  ;;  %553 = vmatpush1.bf16.msra.mxu1 %v1476_v10  ;;  %v1468_v20 = vcombine.low %v126_v12, %v130_v13  ;;  %v127_v5 = vld [vmem:[#allocation5 + $0x190] sm:$0xff]  ;;  %v1479_v8 = vcombine.high %v135_v60, %v139_v63  ;;  %v1481_v10 = vcombine.high %v136_v2, %v140_v3 }
  0x3a   :  { %511 = vmatprep.subr.bf16.mxu0 %v1467_v11  ;;  %v1459_v21 = vcombine.high %v117_v14, %v121_v16  ;;  %554 = vmatprep.subr.bf16.mxu1 %v1469_v15  ;;  %v1461_v22 = vcombine.high %v118_v17, %v122_v18  ;;  %v109_v23 = vld [vmem:[#allocation5 + $0x100] sm:$0xff]  ;;  %v110_v25 = vld [vmem:[#allocation5 + $0x108] sm:$0xff]  ;;  %v1458_v27 = vcombine.low %v117_v14, %v121_v16  ;;  %v1887_v7 = vld [vmem:[#allocation2] sm:$0xff]  }
  0x3b   :  { %v113_v24 = vld [vmem:[#allocation5 + $0x120] sm:$0xff]  ;;  %v114_v26 = vld [vmem:[#allocation5 + $0x128] sm:$0xff]  ;;  %v1460_v28 = vcombine.low %v118_v17, %v122_v18  ;;  %v131_v9 = vld [vmem:[#allocation5 + $0x1b0] sm:$0xff]  ;;  %v1478_v13 = vcombine.low %v135_v60, %v139_v63  ;;  %v1480_v15 = vcombine.low %v136_v2, %v140_v3 }
  0x3c   :  { %v1451_v29 = vcombine.high %v109_v23, %v113_v24  ;;  %v1453_v30 = vcombine.high %v110_v25, %v114_v26  ;;  %v101_v31 = vld [vmem:[#allocation5 + $0xc0] sm:$0xff]  ;;  %v102_v33 = vld [vmem:[#allocation5 + $0xc8] sm:$0xff]  ;;  %v1450_v35 = vcombine.low %v109_v23, %v113_v24  ;;  %v1452_v36 = vcombine.low %v110_v25, %v114_v26  ;;  %v128_v11 = vld [vmem:[#allocation5 + $0x198] sm:$0xff] }
  0x3d   :  { %512 = vmatpush1.bf16.msra.mxu0 %v1466_v19  ;;  %555 = vmatpush1.bf16.msra.mxu1 %v1468_v20  ;;  %v105_v32 = vld [vmem:[#allocation5 + $0xe0] sm:$0xff]  ;;  %v106_v34 = vld [vmem:[#allocation5 + $0xe8] sm:$0xff]  ;;  %v132_v12 = vld [vmem:[#allocation5 + $0x1b8] sm:$0xff]  ;;  %v1471_v16 = vcombine.high %v127_v5, %v131_v9 }
  0x3e   :  { %513 = vmatprep.subr.bf16.mxu0 %v1459_v21  ;;  %556 = vmatprep.subr.bf16.mxu1 %v1461_v22  ;;  %v1443_v37 = vcombine.high %v101_v31, %v105_v32  ;;  %v1445_v38 = vcombine.high %v102_v33, %v106_v34  ;;  %v93_v39 = vld [vmem:[#allocation5 + $0x80] sm:$0xff]  ;;  %v94_v41 = vld [vmem:[#allocation5 + $0x88] sm:$0xff]  ;;  %v1442_v43 = vcombine.low %v101_v31, %v105_v32  ;;  %v119_v14 = vld [vmem:[#allocation5 + $0x150] sm:$0xff] }
  0x3f   :  { %v97_v40 = vld [vmem:[#allocation5 + $0xa0] sm:$0xff]  ;;  %v98_v42 = vld [vmem:[#allocation5 + $0xa8] sm:$0xff]  ;;  %v1444_v44 = vcombine.low %v102_v33, %v106_v34  ;;  %v123_v17 = vld [vmem:[#allocation5 + $0x170] sm:$0xff]  ;;  %v1473_v18 = vcombine.high %v128_v11, %v132_v12  ;;  %v1470_v21 = vcombine.low %v127_v5, %v131_v9  ;;  %v1472_v23 = vcombine.low %v128_v11, %v132_v12 }
  0x40   :  { %v1435_v45 = vcombine.high %v93_v39, %v97_v40  ;;  %v1437_v46 = vcombine.high %v94_v41, %v98_v42  ;;  %v85_v47 = vld [vmem:[#allocation5 + $0x40] sm:$0xff]  ;;  %v86_v49 = vld [vmem:[#allocation5 + $0x48] sm:$0xff]  ;;  %v1434_v51 = vcombine.low %v93_v39, %v97_v40  ;;  %v1436_v52 = vcombine.low %v94_v41, %v98_v42  ;;  %v120_v19 = vld [vmem:[#allocation5 + $0x158] sm:$0xff] }
  0x41   :  { %514 = vmatpush1.bf16.msra.mxu0 %v1458_v27  ;;  %557 = vmatpush1.bf16.msra.mxu1 %v1460_v28  ;;  %v89_v48 = vld [vmem:[#allocation5 + $0x60] sm:$0xff]  ;;  %v90_v50 = vld [vmem:[#allocation5 + $0x68] sm:$0xff]  ;;  %v124_v20 = vld [vmem:[#allocation5 + $0x178] sm:$0xff]  ;;  %v1463_v24 = vcombine.high %v119_v14, %v123_v17 }
  0x42   :  { %515 = vmatprep.subr.bf16.mxu0 %v1451_v29  ;;  %558 = vmatprep.subr.bf16.mxu1 %v1453_v30  ;;  %v1427_v53 = vcombine.high %v85_v47, %v89_v48  ;;  %v77_v54 = vld [vmem:[#allocation5] sm:$0xff]  ;;  %v1429_v56 = vcombine.high %v86_v49, %v90_v50  ;;  %v78_v57 = vld [vmem:[#allocation5 + $0x8] sm:$0xff]  ;;  %v1426_v59 = vcombine.low %v85_v47, %v89_v48  ;;  %v111_v22 = vld [vmem:[#allocation5 + $0x110] sm:$0xff] }
  0x43   :  { %v81_v55 = vld [vmem:[#allocation5 + $0x20] sm:$0xff]  ;;  %v82_v58 = vld [vmem:[#allocation5 + $0x28] sm:$0xff]  ;;  %v1428_v61 = vcombine.low %v86_v49, %v90_v50  ;;  %v115_v25 = vld [vmem:[#allocation5 + $0x130] sm:$0xff]  ;;  %v1465_v26 = vcombine.high %v120_v19, %v124_v20  ;;  %v1462_v29 = vcombine.low %v119_v14, %v123_v17  ;;  %v1464_v31 = vcombine.low %v120_v19, %v124_v20 }
  0x44   :  { %v1419_v62 = vcombine.high %v77_v54, %v81_v55  ;;  %v1421_v1 = vcombine.high %v78_v57, %v82_v58  ;;  %v1418_v4 = vcombine.low %v77_v54, %v81_v55  ;;  %v1420_v6 = vcombine.low %v78_v57, %v82_v58  ;;  %v112_v27 = vld [vmem:[#allocation5 + $0x118] sm:$0xff]  ;;  %v103_v30 = vld [vmem:[#allocation5 + $0xd0] sm:$0xff]  ;;  %v1656_v3 = vld [vmem:[#allocation8 + $0xf8] sm:$0xff]  }
  0x45   :  { %516 = vmatpush1.bf16.msra.mxu0 %v1450_v35  ;;  %559 = vmatpush1.bf16.msra.mxu1 %v1452_v36  ;;  %v116_v28 = vld [vmem:[#allocation5 + $0x138] sm:$0xff]  ;;  %v1455_v32 = vcombine.high %v111_v22, %v115_v25  ;;  %v107_v33 = vld [vmem:[#allocation5 + $0xf0] sm:$0xff]  ;;  %v1657_v5 = vld [vmem:[#allocation8 + $0x38] sm:$0xff]  }
  0x46   :  { %517 = vmatprep.subr.bf16.mxu0 %v1443_v37  ;;  %560 = vmatprep.subr.bf16.mxu1 %v1445_v38  ;;  %v1457_v34 = vcombine.high %v112_v27, %v116_v28  ;;  %v104_v35 = vld [vmem:[#allocation5 + $0xd8] sm:$0xff]  ;;  %v1454_v37 = vcombine.low %v111_v22, %v115_v25  ;;  %v95_v38 = vld [vmem:[#allocation5 + $0x90] sm:$0xff]  ;;  %v1456_v40 = vcombine.low %v112_v27, %v116_v28  ;;  %v1668_v17 = vld [vmem:[#allocation8 + $0xe0] sm:$0xff]  }
  0x47   :  { %v108_v36 = vld [vmem:[#allocation5 + $0xf8] sm:$0xff]  ;;  %v99_v39 = vld [vmem:[#allocation5 + $0xb0] sm:$0xff]  ;;  %v1670_v19 = vld [vmem:[#allocation8 + $0xa0] sm:$0xff]  }
  0x48   :  { %v96_v41 = vld [vmem:[#allocation5 + $0x98] sm:$0xff]  ;;  %v1448_v47 = vcombine.low %v104_v35, %v108_v36  ;;  %v1439_v48 = vcombine.high %v95_v38, %v99_v39  ;;  %v83_v54 = vld [vmem:[#allocation5 + $0x30] sm:$0xff]  ;;  %v1671_v20 = vld [vmem:[#allocation8 + $0x58] sm:$0xff]  }
  0x49   :  { %518 = vmatpush1.bf16.msra.mxu0 %v1442_v43  ;;  %561 = vmatpush1.bf16.msra.mxu1 %v1444_v44  ;;  %v100_v42 = vld [vmem:[#allocation5 + $0xb8] sm:$0xff]  ;;  %v1449_v43 = vcombine.high %v104_v35, %v108_v36  ;;  %v1446_v44 = vcombine.low %v103_v30, %v107_v33  ;;  %v1663_v12 = vld [vmem:[#allocation8 + $0x68] sm:$0xff]   ;;  %v1674_v22 = vld [vmem:[#allocation8 + $0x98] sm:$0xff]  }
  0x4a   :  { %519 = vmatprep.subr.bf16.mxu0 %v1435_v45  ;;  %562 = vmatprep.subr.bf16.mxu1 %v1437_v46  ;;  %v87_v45 = vld [vmem:[#allocation5 + $0x50] sm:$0xff]  ;;  %v88_v49 = vld [vmem:[#allocation5 + $0x58] sm:$0xff]  ;;  %v1440_v55 = vcombine.low %v96_v41, %v100_v42  ;;  %v1687_v35 = vld [vmem:[#allocation8 + $0x178] sm:$0xff]  }
  0x4b   :  { %v91_v46 = vld [vmem:[#allocation5 + $0x70] sm:$0xff]  ;;  %v92_v50 = vld [vmem:[#allocation5 + $0x78] sm:$0xff]  ;;  %v1688_v36 = vld [vmem:[#allocation8 + $0x1f8] sm:$0xff]  }
  0x4c   :  { %v80_v57 = vld [vmem:[#allocation5 + $0x18] sm:$0xff]  ;;  %v1430_v60 = vcombine.low %v87_v45, %v91_v46  ;;  %v1665_v14 = vld [vmem:[#allocation8 + $0x28] sm:$0xff]  }
  0x4d   :  { %520 = vmatpush1.bf16.msra.mxu0 %v1434_v51  ;;  %563 = vmatpush1.bf16.msra.mxu1 %v1436_v52  ;;  %v1441_v51 = vcombine.high %v96_v41, %v100_v42  ;;  %v1438_v52 = vcombine.low %v95_v38, %v99_v39  ;;  %v84_v58 = vld [vmem:[#allocation5 + $0x38] sm:$0xff]  ;;  %v1679_v27 = vld [vmem:[#allocation8 + $0x48] sm:$0xff]  }
  0x4e   :  { %521 = vmatprep.subr.bf16.mxu0 %v1427_v53  ;;  %564 = vmatprep.subr.bf16.mxu1 %v1429_v56  ;;  %v79_v53 = vld [vmem:[#allocation5 + $0x10] sm:$0xff]  ;;  %v1431_v56 = vcombine.high %v87_v45, %v91_v46  ;;  %v1425_v63 = vcombine.high %v80_v57, %v84_v58  ;;  %v1660_v9 = vld [vmem:[#allocation8 + $0xf0] sm:$0xff]  }
  0x4f   :  { %v1422_v2 = vcombine.low %v79_v53, %v83_v54  ;;  %v1662_v11 = vld [vmem:[#allocation8 + $0xb0] sm:$0xff]   ;;  %v1680_v28 = vld [vmem:[#allocation8 + $0xc8] sm:$0xff]  }
  0x50   :  { %v1677_v25 = vld [vmem:[#allocation8 + $0x10] sm:$0xff]  }
  0x51   :  { %522 = vmatpush1.bf16.msra.mxu0 %v1426_v59  ;;  %565 = vmatpush1.bf16.msra.mxu1 %v1428_v61  ;;  %v1433_v59 = vcombine.high %v88_v49, %v92_v50  ;;  %v1432_v61 = vcombine.low %v88_v49, %v92_v50 }
  0x52   :  { %523 = vmatprep.subr.bf16.mxu0 %v1419_v62  ;;  %566 = vmatprep.subr.bf16.mxu1 %v1421_v1  ;;  %v1423_v62 = vcombine.high %v79_v53, %v83_v54  ;;  %v1655_v1 = vld [vmem:[#allocation8 + $0x78] sm:$0xff]  }
  0x55   :  { %524 = vmatpush1.bf16.msra.mxu0 %v1418_v4  ;;  %567 = vmatpush1.bf16.msra.mxu1 %v1420_v6  ;;  %v1424_v4 = vcombine.low %v80_v57, %v84_v58  ;;  %v1658_v6 = vld [vmem:[#allocation8 + $0xb8] sm:$0xff]  }
  0x56   :  { %595 = vmatprep.subr.bf16.mxu0 %v1479_v8  ;;  %638 = vmatprep.subr.bf16.mxu1 %v1481_v10  ;;  %v1659_v8 = vld [vmem:[#allocation8 + $0x70] sm:$0xff]  }
  0x57   :  { %v1661_v10 = vld [vmem:[#allocation8 + $0x30] sm:$0xff]  }
  0x58   :  { %542 = vmatmul.mubr.bf16.vlgmr.msra.gmra.mxu0 %v1887_v7  ;;  %585 = vmatmul.mubr.bf16.vlgmr.msra.gmra.mxu1 %v1887_v7 }
  0x59   :  { %596 = vmatpush1.bf16.msra.mxu0 %v1478_v13  ;;  %639 = vmatpush1.bf16.msra.mxu1 %v1480_v15  ;;  %v1664_v13 = vld [vmem:[#allocation8 + $0xe8] sm:$0xff]  }
  0x5a   :  { %597 = vmatprep.subr.bf16.mxu0 %v1471_v16  ;;  %640 = vmatprep.subr.bf16.mxu1 %v1473_v18  ;;  %v1666_v15 = vld [vmem:[#allocation8 + $0xa8] sm:$0xff]   ;;  %v1667_v16 = vld [vmem:[#allocation8 + $0x60] sm:$0xff]  }
  0x5b   :  { %627 = vmatprep.mubr.bf16.mxu0 %v1835_v0  ;;  %670 = vmatprep.mubr.bf16.mxu1 %v1835_v0  ;;  %v1447_v0 = vcombine.high %v103_v30, %v107_v33  ;;  %v1669_v18 = vld [vmem:[#allocation8 + $0x20] sm:$0xff]   ;;  %v1682_v30 = vld [vmem:[#allocation8 + $0x88] sm:$0xff]  }
  0x5c   :  { %v1685_v33 = vld [vmem:[#allocation8] sm:$0xff]  }
  0x5d   :  { %598 = vmatpush1.bf16.msra.mxu0 %v1470_v21  ;;  %641 = vmatpush1.bf16.msra.mxu1 %v1472_v23  ;;  %v1673_v21 = vld [vmem:[#allocation8 + $0x18] sm:$0xff]   ;;  %v1675_v23 = vld [vmem:[#allocation8 + $0x50] sm:$0xff]  }
  0x5e   :  { %599 = vmatprep.subr.bf16.mxu0 %v1463_v24  ;;  %642 = vmatprep.subr.bf16.mxu1 %v1465_v26  ;;  %v1676_v24 = vld [vmem:[#allocation8 + $0xd0] sm:$0xff]  }
  0x5f   :  { %v1678_v26 = vld [vmem:[#allocation8 + $0x90] sm:$0xff]  }
  0x61   :  { %600 = vmatpush1.bf16.msra.mxu0 %v1462_v29  ;;  %643 = vmatpush1.bf16.msra.mxu1 %v1464_v31  ;;  %v1681_v29 = vld [vmem:[#allocation8 + $0x8] sm:$0xff]   ;;  %v1683_v31 = vld [vmem:[#allocation8 + $0x40] sm:$0xff]  }
  0x62   :  { %601 = vmatprep.subr.bf16.mxu0 %v1455_v32  ;;  %644 = vmatprep.subr.bf16.mxu1 %v1457_v34  ;;  %v1684_v32 = vld [vmem:[#allocation8 + $0xc0] sm:$0xff]  }
  0x63   :  { %v1686_v34 = vld [vmem:[#allocation8 + $0x80] sm:$0xff]  }
  0x65   :  { %602 = vmatpush1.bf16.msra.mxu0 %v1454_v37  ;;  %645 = vmatpush1.bf16.msra.mxu1 %v1456_v40  ;;  %v143_v37 = vlaneseq }
  0x66   :  { %603 = vmatprep.subr.bf16.mxu0 %v1447_v0  ;;  %646 = vmatprep.subr.bf16.mxu1 %v1449_v43  ;;  %v1899_v0 = vld [vmem:[#allocation7] sm:$0xff] }
  0x67   :  { %v1895_v38 = vshrl.u32 %v143_v37, 7 }
  0x69   :  { %604 = vmatpush1.bf16.msra.mxu0 %v1446_v44  ;;  %647 = vmatpush1.bf16.msra.mxu1 %v1448_v47  ;;  %v153_v39 = vsub.s32 2, %v1895_v38  ;;  %v149_v40 = vsub.s32 1, %v1895_v38  ;;  %v145_v41 = vsub.s32 0, %v1895_v38  ;;  %v157_v42 = vsub.s32 3, %v1895_v38 }
  0x6a   :  { %605 = vmatprep.subr.bf16.mxu0 %v1439_v48  ;;  %648 = vmatprep.subr.bf16.mxu1 %v1441_v51 }
  0x6b   :  { %v154_v44 = vrot.slane %v1899_v0, %v153_v39  ;;  %v150_v46 = vrot.slane %v1899_v0, %v149_v40  ;;  %v146_v47 = vrot.slane %v1899_v0, %v145_v41  ;;  %v158_v49 = vrot.slane %v1899_v0, %v157_v42  ;;  %v1710_v39 = vld [vmem:[#allocation8 + $0x190] sm:$0xff]   ;;  %v1711_v40 = vld [vmem:[#allocation8 + $0x148] sm:$0xff]  }
  0x6d   :  { %606 = vmatpush1.bf16.msra.mxu0 %v1438_v52  ;;  %649 = vmatpush1.bf16.msra.mxu1 %v1440_v55 }
  0x6e   :  { %607 = vmatprep.subr.bf16.mxu0 %v1431_v56  ;;  %650 = vmatprep.subr.bf16.mxu1 %v1433_v59 }
  0x71   :  { %608 = vmatpush1.bf16.msra.mxu0 %v1430_v60  ;;  %651 = vmatpush1.bf16.msra.mxu1 %v1432_v61 }
  0x72   :  { %609 = vmatprep.subr.bf16.mxu0 %v1423_v62  ;;  %652 = vmatprep.subr.bf16.mxu1 %v1425_v63 }
  0x75   :  { %610 = vmatpush1.bf16.msra.mxu0 %v1422_v2  ;;  %653 = vmatpush1.bf16.msra.mxu1 %v1424_v4 }
  0x76   :  { %1556 = vmatprep.subr.bf16.mxu0 %v1655_v1  ;;  %1578 = vmatprep.subr.bf16.mxu1 %v1656_v3 }
  0x78   :  { %628 = vmatmul.mubr.bf16.vlgmr.msra.gmra.mxu0 %v1887_v7  ;;  %671 = vmatmul.mubr.bf16.vlgmr.msra.gmra.mxu1 %v1887_v7  ;;  %v1672_v7 = vld [vmem:[#allocation8 + $0xd8] sm:$0xff]  }
  0x79   :  { %1557 = vmatpush3.bf16.msra.mxu0 %v1657_v5  ;;  %1579 = vmatpush3.bf16.msra.mxu1 %v1658_v6 }
  0x7a   :  { %1558 = vmatprep.subr.bf16.mxu0 %v1659_v8  ;;  %1580 = vmatprep.subr.bf16.mxu1 %v1660_v9 }
  0x7d   :  { %1559 = vmatpush3.bf16.msra.mxu0 %v1661_v10  ;;  %1581 = vmatpush3.bf16.msra.mxu1 %v1662_v11  ;;  %v1689_v10 = vld [vmem:[#allocation8 + $0x138] sm:$0xff]  }
  0x7e   :  { %1560 = vmatprep.subr.bf16.mxu0 %v1663_v12  ;;  %1582 = vmatprep.subr.bf16.mxu1 %v1664_v13  ;;  %v1690_v13 = vld [vmem:[#allocation8 + $0x1b8] sm:$0xff]  }
  0x81   :  { %1561 = vmatpush3.bf16.msra.mxu0 %v1665_v14  ;;  %1583 = vmatpush3.bf16.msra.mxu1 %v1666_v15  ;;  %v1691_v14 = vld [vmem:[#allocation8 + $0x170] sm:$0xff]  }
  0x82   :  { %1562 = vmatprep.subr.bf16.mxu0 %v1667_v16  ;;  %1584 = vmatprep.subr.bf16.mxu1 %v1668_v17  ;;  %v1692_v16 = vld [vmem:[#allocation8 + $0x1f0] sm:$0xff]  }
  0x83   :  { %v1693_v17 = vld [vmem:[#allocation8 + $0x130] sm:$0xff]  }
  0x85   :  { %1563 = vmatpush3.bf16.msra.mxu0 %v1669_v18  ;;  %1585 = vmatpush3.bf16.msra.mxu1 %v1670_v19  ;;  %v1694_v18 = vld [vmem:[#allocation8 + $0x1b0] sm:$0xff]   ;;  %v1695_v19 = vld [vmem:[#allocation8 + $0x168] sm:$0xff]  }
  0x86   :  { %1564 = vmatprep.subr.bf16.mxu0 %v1671_v20  ;;  %1586 = vmatprep.subr.bf16.mxu1 %v1672_v7  ;;  %v1696_v20 = vld [vmem:[#allocation8 + $0x1e8] sm:$0xff]  }
  0x87   :  { %v1697_v7 = vld [vmem:[#allocation8 + $0x128] sm:$0xff]  }
  0x89   :  { %1565 = vmatpush3.bf16.msra.mxu0 %v1673_v21  ;;  %1587 = vmatpush3.bf16.msra.mxu1 %v1674_v22  ;;  %v1698_v21 = vld [vmem:[#allocation8 + $0x1a8] sm:$0xff]   ;;  %v1699_v22 = vld [vmem:[#allocation8 + $0x160] sm:$0xff]  }
  0x8a   :  { %1566 = vmatprep.subr.bf16.mxu0 %v1675_v23  ;;  %1588 = vmatprep.subr.bf16.mxu1 %v1676_v24  ;;  %v1700_v23 = vld [vmem:[#allocation8 + $0x1e0] sm:$0xff]  }
  0x8b   :  { %v1701_v24 = vld [vmem:[#allocation8 + $0x120] sm:$0xff]  }
  0x8d   :  { %1567 = vmatpush3.bf16.msra.mxu0 %v1677_v25  ;;  %1589 = vmatpush3.bf16.msra.mxu1 %v1678_v26  ;;  %v1702_v25 = vld [vmem:[#allocation8 + $0x1a0] sm:$0xff]   ;;  %v1703_v26 = vld [vmem:[#allocation8 + $0x158] sm:$0xff]  }
  0x8e   :  { %1568 = vmatprep.subr.bf16.mxu0 %v1679_v27  ;;  %1590 = vmatprep.subr.bf16.mxu1 %v1680_v28  ;;  %v1704_v27 = vld [vmem:[#allocation8 + $0x1d8] sm:$0xff]  }
  0x8f   :  { %v1705_v28 = vld [vmem:[#allocation8 + $0x118] sm:$0xff]  }
  0x91   :  { %1569 = vmatpush3.bf16.msra.mxu0 %v1681_v29  ;;  %1591 = vmatpush3.bf16.msra.mxu1 %v1682_v30  ;;  %v1706_v29 = vld [vmem:[#allocation8 + $0x198] sm:$0xff]   ;;  %v1707_v30 = vld [vmem:[#allocation8 + $0x150] sm:$0xff]  }
  0x92   :  { %1570 = vmatprep.subr.bf16.mxu0 %v1683_v31  ;;  %1592 = vmatprep.subr.bf16.mxu1 %v1684_v32  ;;  %v165_v31 = vsub.s32 5, %v1895_v38  ;;  %v1708_v32 = vld [vmem:[#allocation8 + $0x1d0] sm:$0xff]  }
  0x94   :  { %v166_v42 = vrot.slane %v1899_v0, %v165_v31 }
  0x95   :  { %1571 = vmatpush3.bf16.msra.mxu0 %v1685_v33  ;;  %1593 = vmatpush3.bf16.msra.mxu1 %v1686_v34  ;;  %v161_v33 = vsub.s32 4, %v1895_v38  ;;  %v173_v34 = vsub.s32 7, %v1895_v38 }
  0x96   :  { %1600 = vmatprep.subr.bf16.mxu0 %v1687_v35  ;;  %1622 = vmatprep.subr.bf16.mxu1 %v1688_v36  ;;  %v169_v35 = vsub.s32 6, %v1895_v38  ;;  %v1709_v36 = vld [vmem:[#allocation8 + $0x110] sm:$0xff]   ;;  %v1713_v38 = vld [vmem:[#allocation8 + $0x108] sm:$0xff]  }
 0x118   :  { %v543_v43 = vpop.f32.mrf.mxu0  ;;  %v586_v45 = vpop.f32.mrf.mxu1 }
 0x119   :  { %v587_v52 = vadd.f32 %v586_v45, %v154_v44  ;;  %v544_v56 = vadd.f32 %v543_v43, %v146_v47  ;;  %v1712_v43 = vld [vmem:[#allocation8 + $0x1c8] sm:$0xff]  }
 0x11a   :  { %v545_v48 = vpop.f32.mrf.mxu0  ;;  %v588_v50 = vpop.f32.mrf.mxu1 }
 0x11b   :  { %v546_v53 = vadd.f32 %v545_v48, %v150_v46  ;;  %v589_v57 = vadd.f32 %v588_v50, %v158_v49  ;;  %v683_v1 = vmax.f32 %v587_v52, 0.0  ;;  %v681_v5 = vmax.f32 %v544_v56, 0.0  ;;  %v1714_v50 = vld [vmem:[#allocation8 + $0x188] sm:$0xff]  }
 0x11c   :  { %v547_v51 = vpop.f32.mrf.mxu0  ;;  %v590_v55 = vpop.f32.mrf.mxu1 }
 0x11d   :  { %v548_v54 = vadd.f32 %v547_v51, %v146_v47  ;;  %v591_v58 = vadd.f32 %v590_v55, %v154_v44  ;;  %v682_v2 = vmax.f32 %v546_v53, 0.0  ;;  %v684_v6 = vmax.f32 %v589_v57, 0.0  ;;  %v1715_v51 = vld [vmem:[#allocation8 + $0x140] sm:$0xff]  }
 0x11e   :  { %v549_v59 = vpop.f32.mrf.mxu0  ;;  %v592_v61 = vpop.f32.mrf.mxu1  ;;  %v162_v44 = vrot.slane %v1899_v0, %v161_v33  ;;  %v170_v47 = vrot.slane %v1899_v0, %v169_v35  ;;  %v1716_v55 = vld [vmem:[#allocation8 + $0x1c0] sm:$0xff]  }
 0x11f   :  { %v550_v60 = vadd.f32 %v549_v59, %v150_v46  ;;  %v689_v62 = vmax.f32 %v548_v54, 0.0  ;;  %v593_v63 = vadd.f32 %v592_v61, %v158_v49  ;;  %v691_v3 = vmax.f32 %v591_v58, 0.0 }
 0x120   :  { %v174_v46 = vrot.slane %v1899_v0, %v173_v34 }
 0x121   :  { %v690_v4 = vmax.f32 %v550_v60, 0.0  ;;  %v692_v8 = vmax.f32 %v593_v63, 0.0  ;;  %v697_v11 = vpack.c.bf16 %v689_v62, %v681_v5  ;;  %v699_v15 = vpack.c.bf16 %v691_v3, %v683_v1  ;;  %v1717_v62 = vld [vmem:[#allocation8 + $0x100] sm:$0xff]  }
 0x123   :  { %v698_v9 = vpack.c.bf16 %v690_v4, %v682_v2  ;;  %v700_v12 = vpack.c.bf16 %v692_v8, %v684_v6  ;;  %v1718_v2 = vld [vmem:[#allocation8 + $0x180] sm:$0xff]  }
 0x125   :  { %1256 = vmatprep.mubr.bf16.mxu0 %v698_v9  ;;  %1297 = vmatprep.mubr.bf16.mxu1 %v700_v12 }
 0x126   :  { %1257 = vmatmul.mubr.bf16.vlgmr.msra.gmra.mxu0 %v697_v11  ;;  %1298 = vmatmul.mubr.bf16.vlgmr.msra.gmra.mxu1 %v699_v15 }
 0x127   :  { %1601 = vmatpush3.bf16.msra.mxu0 %v1689_v10  ;;  %1623 = vmatpush3.bf16.msra.mxu1 %v1690_v13 }
 0x128   :  { %1602 = vmatprep.subr.bf16.mxu0 %v1691_v14  ;;  %1624 = vmatprep.subr.bf16.mxu1 %v1692_v16 }
 0x12b   :  { %1603 = vmatpush3.bf16.msra.mxu0 %v1693_v17  ;;  %1625 = vmatpush3.bf16.msra.mxu1 %v1694_v18 }
 0x12c   :  { %1604 = vmatprep.subr.bf16.mxu0 %v1695_v19  ;;  %1626 = vmatprep.subr.bf16.mxu1 %v1696_v20 }
 0x12f   :  { %1605 = vmatpush3.bf16.msra.mxu0 %v1697_v7  ;;  %1627 = vmatpush3.bf16.msra.mxu1 %v1698_v21 }
 0x130   :  { %1606 = vmatprep.subr.bf16.mxu0 %v1699_v22  ;;  %1628 = vmatprep.subr.bf16.mxu1 %v1700_v23  ;;  %v1482_v22 = vld [vmem:[%s1928_s4] ss:$0 sm:$0xff]  ;;  %s1836_s4 = smov [#allocation10]  }
 0x131   :  { %s1403_s15 = sshll.u32 %s1836_s4, 4  ;;  %s1404_s15 = int_to_ptr.vmem [resolvable:$true] %s1403_s15 }
 0x132   :  { %s1799_s16 = scalar_lea.vmem %s1404_s15, 128  ;;  %p1804_p7 = scmp.lt.s32.totalorder %s1404_s15, %s1404_s15 }
 0x133   :  { %1607 = vmatpush3.bf16.msra.mxu0 %v1701_v24  ;;  %1629 = vmatpush3.bf16.msra.mxu1 %v1702_v25  ;;  %p1800_p6 = scmp.ne.s32.totalorder %s1404_s15, %s1799_s16  ;;  %p1805_p8 = scmp.lt.s32.totalorder %s1799_s16, %s1799_s16 }
 0x134   :  { %1608 = vmatprep.subr.bf16.mxu0 %v1703_v26  ;;  %1630 = vmatprep.subr.bf16.mxu1 %v1704_v27 }
 0x135   :  { %p1806_p9 = por %p1805_p8, %p1804_p7 }
 0x137   :  { %1609 = vmatpush3.bf16.msra.mxu0 %v1705_v28  ;;  %1631 = vmatpush3.bf16.msra.mxu1 %v1706_v29  ;;  %p1807_p10 = pnand %p1806_p9, %p1800_p6 }
 0x138   :  { %v629_v37 = vpop.f32.mrf.mxu0  ;;  %1610 = vmatprep.subr.bf16.mxu0 %v1707_v30  ;;  %v672_v41 = vpop.f32.mrf.mxu1  ;;  %1632 = vmatprep.subr.bf16.mxu1 %v1708_v32 }
 0x139   :  { %v630_v56 = vadd.f32 %v629_v37, %v162_v44  ;;  %v673_v60 = vadd.f32 %v672_v41, %v170_v47 }
 0x13a   :  { %v631_v45 = vpop.f32.mrf.mxu0  ;;  %v674_v48 = vpop.f32.mrf.mxu1 }
 0x13b   :  { %1611 = vmatpush3.bf16.msra.mxu0 %v1709_v36  ;;  %1633 = vmatpush3.bf16.msra.mxu1 %v1710_v39  ;;  %v632_v52 = vadd.f32 %v631_v45, %v166_v42  ;;  %v675_v57 = vadd.f32 %v674_v48, %v174_v46  ;;  %v685_v6 = vmax.f32 %v630_v56, 0.0  ;;  %v687_v10 = vmax.f32 %v673_v60, 0.0 }
 0x13c   :  { %v633_v49 = vpop.f32.mrf.mxu0  ;;  %1612 = vmatprep.subr.bf16.mxu0 %v1711_v40  ;;  %v676_v54 = vpop.f32.mrf.mxu1  ;;  %1634 = vmatprep.subr.bf16.mxu1 %v1712_v43 }
 0x13d   :  { %v634_v53 = vadd.f32 %v633_v49, %v162_v44  ;;  %v677_v58 = vadd.f32 %v676_v54, %v170_v47  ;;  %v686_v3 = vmax.f32 %v632_v52, 0.0  ;;  %v688_v8 = vmax.f32 %v675_v57, 0.0 }
 0x13e   :  { %v635_v59 = vpop.f32.mrf.mxu0  ;;  %v678_v0 = vpop.f32.mrf.mxu1 }
 0x13f   :  { %v636_v61 = vadd.f32 %v635_v59, %v166_v42  ;;  %1613 = vmatpush3.bf16.msra.mxu0 %v1713_v38  ;;  %v693_v63 = vmax.f32 %v634_v53, 0.0  ;;  %v679_v1 = vadd.f32 %v678_v0, %v174_v46  ;;  %1635 = vmatpush3.bf16.msra.mxu1 %v1714_v50  ;;  %v695_v4 = vmax.f32 %v677_v58, 0.0 }
 0x140   :  { %1614 = vmatprep.subr.bf16.mxu0 %v1715_v51  ;;  %1636 = vmatprep.subr.bf16.mxu1 %v1716_v55 }
 0x141   :  { %v694_v5 = vmax.f32 %v636_v61, 0.0  ;;  %v696_v9 = vmax.f32 %v679_v1, 0.0  ;;  %v701_v12 = vpack.c.bf16 %v693_v63, %v685_v6  ;;  %v703_v14 = vpack.c.bf16 %v695_v4, %v687_v10 }
 0x143   :  { %v702_v11 = vpack.c.bf16 %v694_v5, %v686_v3  ;;  %1615 = vmatpush3.bf16.msra.mxu0 %v1717_v62  ;;  %v704_v13 = vpack.c.bf16 %v696_v9, %v688_v8  ;;  %1637 = vmatpush3.bf16.msra.mxu1 %v1718_v2 }
 0x145   :  { %1338 = vmatprep.mubr.bf16.mxu0 %v702_v11  ;;  %1379 = vmatprep.mubr.bf16.mxu1 %v704_v13 }
 0x146   :  { %1339 = vmatmul.mubr.bf16.vlgmr.msra.gmra.mxu0 %v701_v12  ;;  %1380 = vmatmul.mubr.bf16.vlgmr.msra.gmra.mxu1 %v703_v14 }
 0x1e6   :  { %v1572_v15 = vpop.f32.mrf.mxu0  ;;  %v1594_v16 = vpop.f32.mrf.mxu1 }
 0x1e8   :  { %v1573_v17 = vpop.f32.mrf.mxu0  ;;  %v1595_v18 = vpop.f32.mrf.mxu1 }
 0x1e9   :  { %v1574_v21 = vadd.f32 %v1573_v17, %v1572_v15  ;;  %v1596_v29 = vadd.f32 %v1595_v18, %v1594_v16 }
 0x1ea   :  { %v1575_v19 = vpop.f32.mrf.mxu0  ;;  %v1597_v20 = vpop.f32.mrf.mxu1 }
 0x1eb   :  { %v1259_v26 = vadd.f32 %v1574_v21, %v1482_v22 }
 0x1ec   :  { %v1576_v7 = vpop.f32.mrf.mxu0  ;;  %v1598_v24 = vpop.f32.mrf.mxu1 }
 0x1ed   :  { %v1577_v23 = vadd.f32 %v1576_v7, %v1575_v19  ;;  %v1300_v34 = vadd.f32 %v1596_v29, %v1259_v26  ;;  %v1599_v35 = vadd.f32 %v1598_v24, %v1597_v20 }
 0x1ef   :  { %v1262_v30 = vadd.f32 %v1577_v23, %v1482_v22 }
 0x1f1   :  { %v1303_v39 = vadd.f32 %v1599_v35, %v1262_v30 }
 0x206   :  { %v1616_v25 = vpop.f32.mrf.mxu0  ;;  %v1638_v27 = vpop.f32.mrf.mxu1 }
 0x208   :  { %v1617_v28 = vpop.f32.mrf.mxu0  ;;  %v1639_v32 = vpop.f32.mrf.mxu1 }
 0x209   :  { %v1618_v31 = vadd.f32 %v1617_v28, %v1616_v25  ;;  %v1640_v43 = vadd.f32 %v1639_v32, %v1638_v27 }
 0x20a   :  { %v1619_v33 = vpop.f32.mrf.mxu0  ;;  %v1641_v36 = vpop.f32.mrf.mxu1 }
 0x20b   :  { %v1341_v40 = vadd.f32 %v1618_v31, %v1300_v34 }
 0x20c   :  { %v1620_v37 = vpop.f32.mrf.mxu0  ;;  %v1642_v42 = vpop.f32.mrf.mxu1 }
 0x20d   :  { %v1621_v41 = vadd.f32 %v1620_v37, %v1619_v33  ;;  %v1643_v45 = vadd.f32 %v1642_v42, %v1641_v36  ;;  %v1382_v46 = vadd.f32 %v1640_v43, %v1341_v40 }
 0x20f   :  { %v1344_v44 = vadd.f32 %v1621_v41, %v1303_v39 }
 0x211   :  { %v1385_v47 = vadd.f32 %v1643_v45, %v1344_v44 }
 0x213   :  { %v1554_v48 = vpack.c.bf16 %v1385_v47, %v1382_v46 }
 0x215   :  { %1555 = vst [vmem:[#allocation10] sm:$0xff] %v1554_v48  }
 0x216   :  { %1810 = shalt.err (!%p1807_p10)
}
 0x217   :  { %1409 = dma.vmem_to_hbm [thread:$0]  %s1404_s15, 128, %s1929_s5, [#allocation4], %s1831_s28, %s1831_s28, %s1832_s29  }
 0x218   :  { %1825 = dma.done.wait [#allocation4], 128  }
 0x219   :  { %1826 = vsyncadd [#allocation4], 4294967168 }
 0x21a   :  { %1413 = vsyncpa [#allocation3], 1 }
 0x21b   :  { %1414 = vsyncpa [#allocation6], 1 }
 0x21c   :  { %1415 = vsyncpa [#allocation9], 1 }
 0x21d   :  { %1416 = vsyncpa [#allocation4], 1 }

// kernel: tpu_custom_call.1
= control target key start
LH: loop header
LB: loop body
LE: loop exit
PB: predicated region body
PF: predicated region fallthrough
CT: control target
= control target key end

     0   :  { %10 = vsyncpa [#allocation3], 0  ;;  %s1924_s0 = inlined_call_operand.hbm [shape: bf16[16,128], index: 0, kind: input, shape index: {}]   ;;  %s1925_s1 = inlined_call_operand.hbm [shape: bf16[128,1024], index: 1, kind: input, shape index: {}]   ;;  %s1926_s2 = inlined_call_operand.hbm [shape: f32[1,1024], index: 2, kind: input, shape index: {}]   ;;  %s1927_s3 = inlined_call_operand.hbm [shape: bf16[1024,128], index: 3, kind: input, shape index: {}]   ;;  %s1928_s4 = inlined_call_operand.vmem [shape: f32[1,128], index: 4, kind: input, shape index: {}]   ;;  %s1929_s5 = inlined_call_operand.hbm [shape: bf16[16,128], index: 5, kind: output, shape index: {}]  }
   0x1   :  { %11 = vsyncpa [#allocation6], 0 }
   0x2   :  { %12 = vsyncpa [#allocation9], 0 }
   0x3   :  { %13 = vsyncpa [#allocation4], 0  ;;  %s1827_s18 = smov [#allocation5]  }
   0x4   :  { %s31_s19 = sshll.u32 %s1827_s18, 4  ;;  %s32_s19 = int_to_ptr.vmem [resolvable:$true] %s31_s19 }
   0x5   :  { %s1727_s20 = scalar_lea.vmem %s32_s19, 8192  ;;  %p1732_p1 = scmp.lt.s32.totalorder %s32_s19, %s32_s19 }
   0x6   :  { %p1728_p0 = scmp.ne.s32.totalorder %s32_s19, %s1727_s20  ;;  %p1733_p2 = scmp.lt.s32.totalorder %s1727_s20, %s1727_s20 }
   0x8   :  { %p1734_p3 = por %p1733_p2, %p1732_p1 }
   0xa   :  { %p1735_p4 = pnand %p1734_p3, %p1728_p0 }
   0xc   :  { %1738 = shalt.err (!%p1735_p4)
}
   0xd   :  { %s1828_s21 = smov 512   ;;  %s1829_s22 = smov 32  }
   0xe   :  { %37 = dma.hbm_to_vmem [thread:$0]  %s1925_s1, 8192, %s32_s19, [#allocation6], %s1828_s21, %s1828_s21, %s1829_s22  }
   0xf   :  { %s1830_s25 = smov [#allocation2]  }
  0x10   :  { %s19_s26 = sshll.u32 %s1830_s25, 4  ;;  %s20_s26 = int_to_ptr.vmem [resolvable:$true] %s19_s26 }
  0x11   :  { %s1747_s27 = scalar_lea.vmem %s20_s26, 128  ;;  %p1752_p6 = scmp.lt.s32.totalorder %s20_s26, %s20_s26 }
  0x12   :  { %p1748_p5 = scmp.ne.s32.totalorder %s20_s26, %s1747_s27  ;;  %p1753_p7 = scmp.lt.s32.totalorder %s1747_s27, %s1747_s27 }
  0x14   :  { %p1754_p8 = por %p1753_p7, %p1752_p6 }
  0x16   :  { %p1755_p9 = pnand %p1754_p8, %p1748_p5 }
  0x18   :  { %1758 = shalt.err (!%p1755_p9)
}
  0x19   :  { %s1831_s28 = smov 64   ;;  %s1832_s29 = smov 4  }
  0x1a   :  { %25 = dma.hbm_to_vmem [thread:$0]  %s1924_s0, 128, %s20_s26, [#allocation3], %s1831_s28, %s1831_s28, %s1832_s29  }
  0x1b   :  { %s1833_s1 = smov [#allocation7]   ;;  %s1834_s8 = smov [#allocation8]  }
  0x1c   :  { %s44_s7 = sshll.u32 %s1833_s1, 4  ;;  %s53_s9 = sshll.u32 %s1834_s8, 4  ;;  %s45_s7 = int_to_ptr.vmem [resolvable:$true] %s44_s7  ;;  %s54_s9 = int_to_ptr.vmem [resolvable:$true] %s53_s9 }
  0x1d   :  { %s1767_s10 = scalar_lea.vmem %s45_s7, 128  ;;  %p1772_p11 = scmp.lt.s32.totalorder %s45_s7, %s45_s7 }
  0x1e   :  { %p1768_p10 = scmp.ne.s32.totalorder %s45_s7, %s1767_s10  ;;  %p1773_p12 = scmp.lt.s32.totalorder %s1767_s10, %s1767_s10 }
  0x20   :  { %p1774_p13 = por %p1773_p12, %p1772_p11 }
  0x22   :  { %p1775_p0 = pnand %p1774_p13, %p1768_p10 }
  0x24   :  { %1778 = shalt.err (!%p1775_p0)
}
  0x25   :  { %47 = dma.hbm_to_vmem [thread:$0]  %s1926_s2, 128, %s45_s7, [#allocation6]  }
  0x26   :  { %s1787_s13 = scalar_lea.vmem %s54_s9, 8192  ;;  %p1792_p2 = scmp.lt.s32.totalorder %s54_s9, %s54_s9 }
  0x27   :  { %p1788_p1 = scmp.ne.s32.totalorder %s54_s9, %s1787_s13  ;;  %p1793_p3 = scmp.lt.s32.totalorder %s1787_s13, %s1787_s13 }
  0x29   :  { %p1794_p4 = por %p1793_p3, %p1792_p2 }
  0x2b   :  { %p1795_p5 = pnand %p1794_p4, %p1788_p1 }
  0x2d   :  { %1798 = shalt.err (!%p1795_p5)
}
  0x2e   :  { %59 = dma.hbm_to_vmem [thread:$0]  %s1927_s3, 8192, %s54_s9, [#allocation9], %s1831_s28, %s1831_s28, %s1832_s29  }
  0x2f   :  { %1819 = dma.done.wait [#allocation3], 128  }
  0x30   :  { %1820 = vsyncadd [#allocation3], 4294967168 }
  0x31   :  { %1821 = dma.done.wait [#allocation6], 8320  }
  0x32   :  { %1822 = vsyncadd [#allocation6], 4294958976 }
  0x33   :  { %1823 = dma.done.wait [#allocation9], 8192  }
  0x34   :  { %1824 = vsyncadd [#allocation9], 4294959104  ;;  %v1835_v0 = vmov 0   ;;  %v133_v1 = vld [vmem:[#allocation5 + $0x1c0] sm:$0xff]  ;;  %v134_v3 = vld [vmem:[#allocation5 + $0x1c8] sm:$0xff] }
  0x35   :  { %541 = vmatprep.mubr.bf16.mxu0 %v1835_v0  ;;  %584 = vmatprep.mubr.bf16.mxu1 %v1835_v0  ;;  %v137_v2 = vld [vmem:[#allocation5 + $0x1e0] sm:$0xff]  ;;  %v138_v5 = vld [vmem:[#allocation5 + $0x1e8] sm:$0xff]  ;;  %v135_v60 = vld [vmem:[#allocation5 + $0x1d0] sm:$0xff] }
  0x36   :  { %v1475_v4 = vcombine.high %v133_v1, %v137_v2  ;;  %v1474_v6 = vcombine.low %v133_v1, %v137_v2  ;;  %v125_v7 = vld [vmem:[#allocation5 + $0x180] sm:$0xff]  ;;  %v1477_v9 = vcombine.high %v134_v3, %v138_v5  ;;  %v1476_v10 = vcombine.low %v134_v3, %v138_v5  ;;  %v126_v12 = vld [vmem:[#allocation5 + $0x188] sm:$0xff]  ;;  %v139_v63 = vld [vmem:[#allocation5 + $0x1f0] sm:$0xff] }
  0x37   :  { %v129_v8 = vld [vmem:[#allocation5 + $0x1a0] sm:$0xff]  ;;  %v130_v13 = vld [vmem:[#allocation5 + $0x1a8] sm:$0xff]  ;;  %v136_v2 = vld [vmem:[#allocation5 + $0x1d8] sm:$0xff] }
  0x38   :  { %v1467_v11 = vcombine.high %v125_v7, %v129_v8  ;;  %v117_v14 = vld [vmem:[#allocation5 + $0x140] sm:$0xff]  ;;  %509 = vmatprep.subr.bf16.mxu0 %v1475_v4  ;;  %v1469_v15 = vcombine.high %v126_v12, %v130_v13  ;;  %v118_v17 = vld [vmem:[#allocation5 + $0x148] sm:$0xff]  ;;  %552 = vmatprep.subr.bf16.mxu1 %v1477_v9  ;;  %v1466_v19 = vcombine.low %v125_v7, %v129_v8  ;;  %v140_v3 = vld [vmem:[#allocation5 + $0x1f8] sm:$0xff] }
  0x39   :  { %v121_v16 = vld [vmem:[#allocation5 + $0x160] sm:$0xff]  ;;  %v122_v18 = vld [vmem:[#allocation5 + $0x168] sm:$0xff]  ;;  %510 = vmatpush1.bf16.msra.mxu0 %v1474_v6  ;;  %553 = vmatpush1.bf16.msra.mxu1 %v1476_v10  ;;  %v1468_v20 = vcombine.low %v126_v12, %v130_v13  ;;  %v127_v5 = vld [vmem:[#allocation5 + $0x190] sm:$0xff]  ;;  %v1479_v8 = vcombine.high %v135_v60, %v139_v63  ;;  %v1481_v10 = vcombine.high %v136_v2, %v140_v3 }
  0x3a   :  { %511 = vmatprep.subr.bf16.mxu0 %v1467_v11  ;;  %v1459_v21 = vcombine.high %v117_v14, %v121_v16  ;;  %554 = vmatprep.subr.bf16.mxu1 %v1469_v15  ;;  %v1461_v22 = vcombine.high %v118_v17, %v122_v18  ;;  %v109_v23 = vld [vmem:[#allocation5 + $0x100] sm:$0xff]  ;;  %v110_v25 = vld [vmem:[#allocation5 + $0x108] sm:$0xff]  ;;  %v1458_v27 = vcombine.low %v117_v14, %v121_v16  ;;  %v1887_v7 = vld [vmem:[#allocation2] sm:$0xff]  }
  0x3b   :  { %v113_v24 = vld [vmem:[#allocation5 + $0x120] sm:$0xff]  ;;  %v114_v26 = vld [vmem:[#allocation5 + $0x128] sm:$0xff]  ;;  %v1460_v28 = vcombine.low %v118_v17, %v122_v18  ;;  %v131_v9 = vld [vmem:[#allocation5 + $0x1b0] sm:$0xff]  ;;  %v1478_v13 = vcombine.low %v135_v60, %v139_v63  ;;  %v1480_v15 = vcombine.low %v136_v2, %v140_v3 }
  0x3c   :  { %v1451_v29 = vcombine.high %v109_v23, %v113_v24  ;;  %v1453_v30 = vcombine.high %v110_v25, %v114_v26  ;;  %v101_v31 = vld [vmem:[#allocation5 + $0xc0] sm:$0xff]  ;;  %v102_v33 = vld [vmem:[#allocation5 + $0xc8] sm:$0xff]  ;;  %v1450_v35 = vcombine.low %v109_v23, %v113_v24  ;;  %v1452_v36 = vcombine.low %v110_v25, %v114_v26  ;;  %v128_v11 = vld [vmem:[#allocation5 + $0x198] sm:$0xff] }
  0x3d   :  { %512 = vmatpush1.bf16.msra.mxu0 %v1466_v19  ;;  %555 = vmatpush1.bf16.msra.mxu1 %v1468_v20  ;;  %v105_v32 = vld [vmem:[#allocation5 + $0xe0] sm:$0xff]  ;;  %v106_v34 = vld [vmem:[#allocation5 + $0xe8] sm:$0xff]  ;;  %v132_v12 = vld [vmem:[#allocation5 + $0x1b8] sm:$0xff]  ;;  %v1471_v16 = vcombine.high %v127_v5, %v131_v9 }
  0x3e   :  { %513 = vmatprep.subr.bf16.mxu0 %v1459_v21  ;;  %556 = vmatprep.subr.bf16.mxu1 %v1461_v22  ;;  %v1443_v37 = vcombine.high %v101_v31, %v105_v32  ;;  %v1445_v38 = vcombine.high %v102_v33, %v106_v34  ;;  %v93_v39 = vld [vmem:[#allocation5 + $0x80] sm:$0xff]  ;;  %v94_v41 = vld [vmem:[#allocation5 + $0x88] sm:$0xff]  ;;  %v1442_v43 = vcombine.low %v101_v31, %v105_v32  ;;  %v119_v14 = vld [vmem:[#allocation5 + $0x150] sm:$0xff] }
  0x3f   :  { %v97_v40 = vld [vmem:[#allocation5 + $0xa0] sm:$0xff]  ;;  %v98_v42 = vld [vmem:[#allocation5 + $0xa8] sm:$0xff]  ;;  %v1444_v44 = vcombine.low %v102_v33, %v106_v34  ;;  %v123_v17 = vld [vmem:[#allocation5 + $0x170] sm:$0xff]  ;;  %v1473_v18 = vcombine.high %v128_v11, %v132_v12  ;;  %v1470_v21 = vcombine.low %v127_v5, %v131_v9  ;;  %v1472_v23 = vcombine.low %v128_v11, %v132_v12 }
  0x40   :  { %v1435_v45 = vcombine.high %v93_v39, %v97_v40  ;;  %v1437_v46 = vcombine.high %v94_v41, %v98_v42  ;;  %v85_v47 = vld [vmem:[#allocation5 + $0x40] sm:$0xff]  ;;  %v86_v49 = vld [vmem:[#allocation5 + $0x48] sm:$0xff]  ;;  %v1434_v51 = vcombine.low %v93_v39, %v97_v40  ;;  %v1436_v52 = vcombine.low %v94_v41, %v98_v42  ;;  %v120_v19 = vld [vmem:[#allocation5 + $0x158] sm:$0xff] }
  0x41   :  { %514 = vmatpush1.bf16.msra.mxu0 %v1458_v27  ;;  %557 = vmatpush1.bf16.msra.mxu1 %v1460_v28  ;;  %v89_v48 = vld [vmem:[#allocation5 + $0x60] sm:$0xff]  ;;  %v90_v50 = vld [vmem:[#allocation5 + $0x68] sm:$0xff]  ;;  %v124_v20 = vld [vmem:[#allocation5 + $0x178] sm:$0xff]  ;;  %v1463_v24 = vcombine.high %v119_v14, %v123_v17 }
  0x42   :  { %515 = vmatprep.subr.bf16.mxu0 %v1451_v29  ;;  %558 = vmatprep.subr.bf16.mxu1 %v1453_v30  ;;  %v1427_v53 = vcombine.high %v85_v47, %v89_v48  ;;  %v77_v54 = vld [vmem:[#allocation5] sm:$0xff]  ;;  %v1429_v56 = vcombine.high %v86_v49, %v90_v50  ;;  %v78_v57 = vld [vmem:[#allocation5 + $0x8] sm:$0xff]  ;;  %v1426_v59 = vcombine.low %v85_v47, %v89_v48  ;;  %v111_v22 = vld [vmem:[#allocation5 + $0x110] sm:$0xff] }
  0x43   :  { %v81_v55 = vld [vmem:[#allocation5 + $0x20] sm:$0xff]  ;;  %v82_v58 = vld [vmem:[#allocation5 + $0x28] sm:$0xff]  ;;  %v1428_v61 = vcombine.low %v86_v49, %v90_v50  ;;  %v115_v25 = vld [vmem:[#allocation5 + $0x130] sm:$0xff]  ;;  %v1465_v26 = vcombine.high %v120_v19, %v124_v20  ;;  %v1462_v29 = vcombine.low %v119_v14, %v123_v17  ;;  %v1464_v31 = vcombine.low %v120_v19, %v124_v20 }
  0x44   :  { %v1419_v62 = vcombine.high %v77_v54, %v81_v55  ;;  %v1421_v1 = vcombine.high %v78_v57, %v82_v58  ;;  %v1418_v4 = vcombine.low %v77_v54, %v81_v55  ;;  %v1420_v6 = vcombine.low %v78_v57, %v82_v58  ;;  %v112_v27 = vld [vmem:[#allocation5 + $0x118] sm:$0xff]  ;;  %v103_v30 = vld [vmem:[#allocation5 + $0xd0] sm:$0xff]  ;;  %v1656_v3 = vld [vmem:[#allocation8 + $0xf8] sm:$0xff]  }
  0x45   :  { %516 = vmatpush1.bf16.msra.mxu0 %v1450_v35  ;;  %559 = vmatpush1.bf16.msra.mxu1 %v1452_v36  ;;  %v116_v28 = vld [vmem:[#allocation5 + $0x138] sm:$0xff]  ;;  %v1455_v32 = vcombine.high %v111_v22, %v115_v25  ;;  %v107_v33 = vld [vmem:[#allocation5 + $0xf0] sm:$0xff]  ;;  %v1657_v5 = vld [vmem:[#allocation8 + $0x38] sm:$0xff]  }
  0x46   :  { %517 = vmatprep.subr.bf16.mxu0 %v1443_v37  ;;  %560 = vmatprep.subr.bf16.mxu1 %v1445_v38  ;;  %v1457_v34 = vcombine.high %v112_v27, %v116_v28  ;;  %v104_v35 = vld [vmem:[#allocation5 + $0xd8] sm:$0xff]  ;;  %v1454_v37 = vcombine.low %v111_v22, %v115_v25  ;;  %v95_v38 = vld [vmem:[#allocation5 + $0x90] sm:$0xff]  ;;  %v1456_v40 = vcombine.low %v112_v27, %v116_v28  ;;  %v1668_v17 = vld [vmem:[#allocation8 + $0xe0] sm:$0xff]  }
  0x47   :  { %v108_v36 = vld [vmem:[#allocation5 + $0xf8] sm:$0xff]  ;;  %v99_v39 = vld [vmem:[#allocation5 + $0xb0] sm:$0xff]  ;;  %v1670_v19 = vld [vmem:[#allocation8 + $0xa0] sm:$0xff]  }
  0x48   :  { %v96_v41 = vld [vmem:[#allocation5 + $0x98] sm:$0xff]  ;;  %v1448_v47 = vcombine.low %v104_v35, %v108_v36  ;;  %v1439_v48 = vcombine.high %v95_v38, %v99_v39  ;;  %v83_v54 = vld [vmem:[#allocation5 + $0x30] sm:$0xff]  ;;  %v1671_v20 = vld [vmem:[#allocation8 + $0x58] sm:$0xff]  }
  0x49   :  { %518 = vmatpush1.bf16.msra.mxu0 %v1442_v43  ;;  %561 = vmatpush1.bf16.msra.mxu1 %v1444_v44  ;;  %v100_v42 = vld [vmem:[#allocation5 + $0xb8] sm:$0xff]  ;;  %v1449_v43 = vcombine.high %v104_v35, %v108_v36  ;;  %v1446_v44 = vcombine.low %v103_v30, %v107_v33  ;;  %v1663_v12 = vld [vmem:[#allocation8 + $0x68] sm:$0xff]   ;;  %v1674_v22 = vld [vmem:[#allocation8 + $0x98] sm:$0xff]  }
  0x4a   :  { %519 = vmatprep.subr.bf16.mxu0 %v1435_v45  ;;  %562 = vmatprep.subr.bf16.mxu1 %v1437_v46  ;;  %v87_v45 = vld [vmem:[#allocation5 + $0x50] sm:$0xff]  ;;  %v88_v49 = vld [vmem:[#allocation5 + $0x58] sm:$0xff]  ;;  %v1440_v55 = vcombine.low %v96_v41, %v100_v42  ;;  %v1687_v35 = vld [vmem:[#allocation8 + $0x178] sm:$0xff]  }
  0x4b   :  { %v91_v46 = vld [vmem:[#allocation5 + $0x70] sm:$0xff]  ;;  %v92_v50 = vld [vmem:[#allocation5 + $0x78] sm:$0xff]  ;;  %v1688_v36 = vld [vmem:[#allocation8 + $0x1f8] sm:$0xff]  }
  0x4c   :  { %v80_v57 = vld [vmem:[#allocation5 + $0x18] sm:$0xff]  ;;  %v1430_v60 = vcombine.low %v87_v45, %v91_v46  ;;  %v1665_v14 = vld [vmem:[#allocation8 + $0x28] sm:$0xff]  }
  0x4d   :  { %520 = vmatpush1.bf16.msra.mxu0 %v1434_v51  ;;  %563 = vmatpush1.bf16.msra.mxu1 %v1436_v52  ;;  %v1441_v51 = vcombine.high %v96_v41, %v100_v42  ;;  %v1438_v52 = vcombine.low %v95_v38, %v99_v39  ;;  %v84_v58 = vld [vmem:[#allocation5 + $0x38] sm:$0xff]  ;;  %v1679_v27 = vld [vmem:[#allocation8 + $0x48] sm:$0xff]  }
  0x4e   :  { %521 = vmatprep.subr.bf16.mxu0 %v1427_v53  ;;  %564 = vmatprep.subr.bf16.mxu1 %v1429_v56  ;;  %v79_v53 = vld [vmem:[#allocation5 + $0x10] sm:$0xff]  ;;  %v1431_v56 = vcombine.high %v87_v45, %v91_v46  ;;  %v1425_v63 = vcombine.high %v80_v57, %v84_v58  ;;  %v1660_v9 = vld [vmem:[#allocation8 + $0xf0] sm:$0xff]  }
  0x4f   :  { %v1422_v2 = vcombine.low %v79_v53, %v83_v54  ;;  %v1662_v11 = vld [vmem:[#allocation8 + $0xb0] sm:$0xff]   ;;  %v1680_v28 = vld [vmem:[#allocation8 + $0xc8] sm:$0xff]  }
  0x50   :  { %v1677_v25 = vld [vmem:[#allocation8 + $0x10] sm:$0xff]  }
  0x51   :  { %522 = vmatpush1.bf16.msra.mxu0 %v1426_v59  ;;  %565 = vmatpush1.bf16.msra.mxu1 %v1428_v61  ;;  %v1433_v59 = vcombine.high %v88_v49, %v92_v50  ;;  %v1432_v61 = vcombine.low %v88_v49, %v92_v50 }
  0x52   :  { %523 = vmatprep.subr.bf16.mxu0 %v1419_v62  ;;  %566 = vmatprep.subr.bf16.mxu1 %v1421_v1  ;;  %v1423_v62 = vcombine.high %v79_v53, %v83_v54  ;;  %v1655_v1 = vld [vmem:[#allocation8 + $0x78] sm:$0xff]  }
  0x55   :  { %524 = vmatpush1.bf16.msra.mxu0 %v1418_v4  ;;  %567 = vmatpush1.bf16.msra.mxu1 %v1420_v6  ;;  %v1424_v4 = vcombine.low %v80_v57, %v84_v58  ;;  %v1658_v6 = vld [vmem:[#allocation8 + $0xb8] sm:$0xff]  }
  0x56   :  { %595 = vmatprep.subr.bf16.mxu0 %v1479_v8  ;;  %638 = vmatprep.subr.bf16.mxu1 %v1481_v10  ;;  %v1659_v8 = vld [vmem:[#allocation8 + $0x70] sm:$0xff]  }
  0x57   :  { %v1661_v10 = vld [vmem:[#allocation8 + $0x30] sm:$0xff]  }
  0x58   :  { %542 = vmatmul.mubr.bf16.vlgmr.msra.gmra.mxu0 %v1887_v7  ;;  %585 = vmatmul.mubr.bf16.vlgmr.msra.gmra.mxu1 %v1887_v7 }
  0x59   :  { %596 = vmatpush1.bf16.msra.mxu0 %v1478_v13  ;;  %639 = vmatpush1.bf16.msra.mxu1 %v1480_v15  ;;  %v1664_v13 = vld [vmem:[#allocation8 + $0xe8] sm:$0xff]  }
  0x5a   :  { %597 = vmatprep.subr.bf16.mxu0 %v1471_v16  ;;  %640 = vmatprep.subr.bf16.mxu1 %v1473_v18  ;;  %v1666_v15 = vld [vmem:[#allocation8 + $0xa8] sm:$0xff]   ;;  %v1667_v16 = vld [vmem:[#allocation8 + $0x60] sm:$0xff]  }
  0x5b   :  { %627 = vmatprep.mubr.bf16.mxu0 %v1835_v0  ;;  %670 = vmatprep.mubr.bf16.mxu1 %v1835_v0  ;;  %v1447_v0 = vcombine.high %v103_v30, %v107_v33  ;;  %v1669_v18 = vld [vmem:[#allocation8 + $0x20] sm:$0xff]   ;;  %v1682_v30 = vld [vmem:[#allocation8 + $0x88] sm:$0xff]  }
  0x5c   :  { %v1685_v33 = vld [vmem:[#allocation8] sm:$0xff]  }
  0x5d   :  { %598 = vmatpush1.bf16.msra.mxu0 %v1470_v21  ;;  %641 = vmatpush1.bf16.msra.mxu1 %v1472_v23  ;;  %v1673_v21 = vld [vmem:[#allocation8 + $0x18] sm:$0xff]   ;;  %v1675_v23 = vld [vmem:[#allocation8 + $0x50] sm:$0xff]  }
  0x5e   :  { %599 = vmatprep.subr.bf16.mxu0 %v1463_v24  ;;  %642 = vmatprep.subr.bf16.mxu1 %v1465_v26  ;;  %v1676_v24 = vld [vmem:[#allocation8 + $0xd0] sm:$0xff]  }
  0x5f   :  { %v1678_v26 = vld [vmem:[#allocation8 + $0x90] sm:$0xff]  }
  0x61   :  { %600 = vmatpush1.bf16.msra.mxu0 %v1462_v29  ;;  %643 = vmatpush1.bf16.msra.mxu1 %v1464_v31  ;;  %v1681_v29 = vld [vmem:[#allocation8 + $0x8] sm:$0xff]   ;;  %v1683_v31 = vld [vmem:[#allocation8 + $0x40] sm:$0xff]  }
  0x62   :  { %601 = vmatprep.subr.bf16.mxu0 %v1455_v32  ;;  %644 = vmatprep.subr.bf16.mxu1 %v1457_v34  ;;  %v1684_v32 = vld [vmem:[#allocation8 + $0xc0] sm:$0xff]  }
  0x63   :  { %v1686_v34 = vld [vmem:[#allocation8 + $0x80] sm:$0xff]  }
  0x65   :  { %602 = vmatpush1.bf16.msra.mxu0 %v1454_v37  ;;  %645 = vmatpush1.bf16.msra.mxu1 %v1456_v40  ;;  %v143_v37 = vlaneseq }
  0x66   :  { %603 = vmatprep.subr.bf16.mxu0 %v1447_v0  ;;  %646 = vmatprep.subr.bf16.mxu1 %v1449_v43  ;;  %v1899_v0 = vld [vmem:[#allocation7] sm:$0xff] }
  0x67   :  { %v1895_v38 = vshrl.u32 %v143_v37, 7 }
  0x69   :  { %604 = vmatpush1.bf16.msra.mxu0 %v1446_v44  ;;  %647 = vmatpush1.bf16.msra.mxu1 %v1448_v47  ;;  %v153_v39 = vsub.s32 2, %v1895_v38  ;;  %v149_v40 = vsub.s32 1, %v1895_v38  ;;  %v145_v41 = vsub.s32 0, %v1895_v38  ;;  %v157_v42 = vsub.s32 3, %v1895_v38 }
  0x6a   :  { %605 = vmatprep.subr.bf16.mxu0 %v1439_v48  ;;  %648 = vmatprep.subr.bf16.mxu1 %v1441_v51 }
  0x6b   :  { %v154_v44 = vrot.slane %v1899_v0, %v153_v39  ;;  %v150_v46 = vrot.slane %v1899_v0, %v149_v40  ;;  %v146_v47 = vrot.slane %v1899_v0, %v145_v41  ;;  %v158_v49 = vrot.slane %v1899_v0, %v157_v42  ;;  %v1710_v39 = vld [vmem:[#allocation8 + $0x190] sm:$0xff]   ;;  %v1711_v40 = vld [vmem:[#allocation8 + $0x148] sm:$0xff]  }
  0x6d   :  { %606 = vmatpush1.bf16.msra.mxu0 %v1438_v52  ;;  %649 = vmatpush1.bf16.msra.mxu1 %v1440_v55 }
  0x6e   :  { %607 = vmatprep.subr.bf16.mxu0 %v1431_v56  ;;  %650 = vmatprep.subr.bf16.mxu1 %v1433_v59 }
  0x71   :  { %608 = vmatpush1.bf16.msra.mxu0 %v1430_v60  ;;  %651 = vmatpush1.bf16.msra.mxu1 %v1432_v61 }
  0x72   :  { %609 = vmatprep.subr.bf16.mxu0 %v1423_v62  ;;  %652 = vmatprep.subr.bf16.mxu1 %v1425_v63 }
  0x75   :  { %610 = vmatpush1.bf16.msra.mxu0 %v1422_v2  ;;  %653 = vmatpush1.bf16.msra.mxu1 %v1424_v4 }
  0x76   :  { %1556 = vmatprep.subr.bf16.mxu0 %v1655_v1  ;;  %1578 = vmatprep.subr.bf16.mxu1 %v1656_v3 }
  0x78   :  { %628 = vmatmul.mubr.bf16.vlgmr.msra.gmra.mxu0 %v1887_v7  ;;  %671 = vmatmul.mubr.bf16.vlgmr.msra.gmra.mxu1 %v1887_v7  ;;  %v1672_v7 = vld [vmem:[#allocation8 + $0xd8] sm:$0xff]  }
  0x79   :  { %1557 = vmatpush3.bf16.msra.mxu0 %v1657_v5  ;;  %1579 = vmatpush3.bf16.msra.mxu1 %v1658_v6 }
  0x7a   :  { %1558 = vmatprep.subr.bf16.mxu0 %v1659_v8  ;;  %1580 = vmatprep.subr.bf16.mxu1 %v1660_v9 }
  0x7d   :  { %1559 = vmatpush3.bf16.msra.mxu0 %v1661_v10  ;;  %1581 = vmatpush3.bf16.msra.mxu1 %v1662_v11  ;;  %v1689_v10 = vld [vmem:[#allocation8 + $0x138] sm:$0xff]  }
  0x7e   :  { %1560 = vmatprep.subr.bf16.mxu0 %v1663_v12  ;;  %1582 = vmatprep.subr.bf16.mxu1 %v1664_v13  ;;  %v1690_v13 = vld [vmem:[#allocation8 + $0x1b8] sm:$0xff]  }
  0x81   :  { %1561 = vmatpush3.bf16.msra.mxu0 %v1665_v14  ;;  %1583 = vmatpush3.bf16.msra.mxu1 %v1666_v15  ;;  %v1691_v14 = vld [vmem:[#allocation8 + $0x170] sm:$0xff]  }
  0x82   :  { %1562 = vmatprep.subr.bf16.mxu0 %v1667_v16  ;;  %1584 = vmatprep.subr.bf16.mxu1 %v1668_v17  ;;  %v1692_v16 = vld [vmem:[#allocation8 + $0x1f0] sm:$0xff]  }
  0x83   :  { %v1693_v17 = vld [vmem:[#allocation8 + $0x130] sm:$0xff]  }
  0x85   :  { %1563 = vmatpush3.bf16.msra.mxu0 %v1669_v18  ;;  %1585 = vmatpush3.bf16.msra.mxu1 %v1670_v19  ;;  %v1694_v18 = vld [vmem:[#allocation8 + $0x1b0] sm:$0xff]   ;;  %v1695_v19 = vld [vmem:[#allocation8 + $0x168] sm:$0xff]  }
  0x86   :  { %1564 = vmatprep.subr.bf16.mxu0 %v1671_v20  ;;  %1586 = vmatprep.subr.bf16.mxu1 %v1672_v7  ;;  %v1696_v20 = vld [vmem:[#allocation8 + $0x1e8] sm:$0xff]  }
  0x87   :  { %v1697_v7 = vld [vmem:[#allocation8 + $0x128] sm:$0xff]  }
  0x89   :  { %1565 = vmatpush3.bf16.msra.mxu0 %v1673_v21  ;;  %1587 = vmatpush3.bf16.msra.mxu1 %v1674_v22  ;;  %v1698_v21 = vld [vmem:[#allocation8 + $0x1a8] sm:$0xff]   ;;  %v1699_v22 = vld [vmem:[#allocation8 + $0x160] sm:$0xff]  }
  0x8a   :  { %1566 = vmatprep.subr.bf16.mxu0 %v1675_v23  ;;  %1588 = vmatprep.subr.bf16.mxu1 %v1676_v24  ;;  %v1700_v23 = vld [vmem:[#allocation8 + $0x1e0] sm:$0xff]  }
  0x8b   :  { %v1701_v24 = vld [vmem:[#allocation8 + $0x120] sm:$0xff]  }
  0x8d   :  { %1567 = vmatpush3.bf16.msra.mxu0 %v1677_v25  ;;  %1589 = vmatpush3.bf16.msra.mxu1 %v1678_v26  ;;  %v1702_v25 = vld [vmem:[#allocation8 + $0x1a0] sm:$0xff]   ;;  %v1703_v26 = vld [vmem:[#allocation8 + $0x158] sm:$0xff]  }
  0x8e   :  { %1568 = vmatprep.subr.bf16.mxu0 %v1679_v27  ;;  %1590 = vmatprep.subr.bf16.mxu1 %v1680_v28  ;;  %v1704_v27 = vld [vmem:[#allocation8 + $0x1d8] sm:$0xff]  }
  0x8f   :  { %v1705_v28 = vld [vmem:[#allocation8 + $0x118] sm:$0xff]  }
  0x91   :  { %1569 = vmatpush3.bf16.msra.mxu0 %v1681_v29  ;;  %1591 = vmatpush3.bf16.msra.mxu1 %v1682_v30  ;;  %v1706_v29 = vld [vmem:[#allocation8 + $0x198] sm:$0xff]   ;;  %v1707_v30 = vld [vmem:[#allocation8 + $0x150] sm:$0xff]  }
  0x92   :  { %1570 = vmatprep.subr.bf16.mxu0 %v1683_v31  ;;  %1592 = vmatprep.subr.bf16.mxu1 %v1684_v32  ;;  %v165_v31 = vsub.s32 5, %v1895_v38  ;;  %v1708_v32 = vld [vmem:[#allocation8 + $0x1d0] sm:$0xff]  }
  0x94   :  { %v166_v42 = vrot.slane %v1899_v0, %v165_v31 }
  0x95   :  { %1571 = vmatpush3.bf16.msra.mxu0 %v1685_v33  ;;  %1593 = vmatpush3.bf16.msra.mxu1 %v1686_v34  ;;  %v161_v33 = vsub.s32 4, %v1895_v38  ;;  %v173_v34 = vsub.s32 7, %v1895_v38 }
  0x96   :  { %1600 = vmatprep.subr.bf16.mxu0 %v1687_v35  ;;  %1622 = vmatprep.subr.bf16.mxu1 %v1688_v36  ;;  %v169_v35 = vsub.s32 6, %v1895_v38  ;;  %v1709_v36 = vld [vmem:[#allocation8 + $0x110] sm:$0xff]   ;;  %v1713_v38 = vld [vmem:[#allocation8 + $0x108] sm:$0xff]  }
 0x118   :  { %v543_v43 = vpop.f32.mrf.mxu0  ;;  %v586_v45 = vpop.f32.mrf.mxu1 }
 0x119   :  { %v587_v52 = vadd.f32 %v586_v45, %v154_v44  ;;  %v544_v56 = vadd.f32 %v543_v43, %v146_v47  ;;  %v1712_v43 = vld [vmem:[#allocation8 + $0x1c8] sm:$0xff]  }
 0x11a   :  { %v545_v48 = vpop.f32.mrf.mxu0  ;;  %v588_v50 = vpop.f32.mrf.mxu1 }
 0x11b   :  { %v546_v53 = vadd.f32 %v545_v48, %v150_v46  ;;  %v589_v57 = vadd.f32 %v588_v50, %v158_v49  ;;  %v683_v1 = vmax.f32 %v587_v52, 0.0  ;;  %v681_v5 = vmax.f32 %v544_v56, 0.0  ;;  %v1714_v50 = vld [vmem:[#allocation8 + $0x188] sm:$0xff]  }
 0x11c   :  { %v547_v51 = vpop.f32.mrf.mxu0  ;;  %v590_v55 = vpop.f32.mrf.mxu1 }
 0x11d   :  { %v548_v54 = vadd.f32 %v547_v51, %v146_v47  ;;  %v591_v58 = vadd.f32 %v590_v55, %v154_v44  ;;  %v682_v2 = vmax.f32 %v546_v53, 0.0  ;;  %v684_v6 = vmax.f32 %v589_v57, 0.0  ;;  %v1715_v51 = vld [vmem:[#allocation8 + $0x140] sm:$0xff]  }
 0x11e   :  { %v549_v59 = vpop.f32.mrf.mxu0  ;;  %v592_v61 = vpop.f32.mrf.mxu1  ;;  %v162_v44 = vrot.slane %v1899_v0, %v161_v33  ;;  %v170_v47 = vrot.slane %v1899_v0, %v169_v35  ;;  %v1716_v55 = vld [vmem:[#allocation8 + $0x1c0] sm:$0xff]  }
 0x11f   :  { %v550_v60 = vadd.f32 %v549_v59, %v150_v46  ;;  %v689_v62 = vmax.f32 %v548_v54, 0.0  ;;  %v593_v63 = vadd.f32 %v592_v61, %v158_v49  ;;  %v691_v3 = vmax.f32 %v591_v58, 0.0 }
 0x120   :  { %v174_v46 = vrot.slane %v1899_v0, %v173_v34 }
 0x121   :  { %v690_v4 = vmax.f32 %v550_v60, 0.0  ;;  %v692_v8 = vmax.f32 %v593_v63, 0.0  ;;  %v697_v11 = vpack.c.bf16 %v689_v62, %v681_v5  ;;  %v699_v15 = vpack.c.bf16 %v691_v3, %v683_v1  ;;  %v1717_v62 = vld [vmem:[#allocation8 + $0x100] sm:$0xff]  }
 0x123   :  { %v698_v9 = vpack.c.bf16 %v690_v4, %v682_v2  ;;  %v700_v12 = vpack.c.bf16 %v692_v8, %v684_v6  ;;  %v1718_v2 = vld [vmem:[#allocation8 + $0x180] sm:$0xff]  }
 0x125   :  { %1256 = vmatprep.mubr.bf16.mxu0 %v698_v9  ;;  %1297 = vmatprep.mubr.bf16.mxu1 %v700_v12 }
 0x126   :  { %1257 = vmatmul.mubr.bf16.vlgmr.msra.gmra.mxu0 %v697_v11  ;;  %1298 = vmatmul.mubr.bf16.vlgmr.msra.gmra.mxu1 %v699_v15 }
 0x127   :  { %1601 = vmatpush3.bf16.msra.mxu0 %v1689_v10  ;;  %1623 = vmatpush3.bf16.msra.mxu1 %v1690_v13 }
 0x128   :  { %1602 = vmatprep.subr.bf16.mxu0 %v1691_v14  ;;  %1624 = vmatprep.subr.bf16.mxu1 %v1692_v16 }
 0x12b   :  { %1603 = vmatpush3.bf16.msra.mxu0 %v1693_v17  ;;  %1625 = vmatpush3.bf16.msra.mxu1 %v1694_v18 }
 0x12c   :  { %1604 = vmatprep.subr.bf16.mxu0 %v1695_v19  ;;  %1626 = vmatprep.subr.bf16.mxu1 %v1696_v20 }
 0x12f   :  { %1605 = vmatpush3.bf16.msra.mxu0 %v1697_v7  ;;  %1627 = vmatpush3.bf16.msra.mxu1 %v1698_v21 }
 0x130   :  { %1606 = vmatprep.subr.bf16.mxu0 %v1699_v22  ;;  %1628 = vmatprep.subr.bf16.mxu1 %v1700_v23  ;;  %v1482_v22 = vld [vmem:[%s1928_s4] ss:$0 sm:$0xff]  ;;  %s1836_s4 = smov [#allocation10]  }
 0x131   :  { %s1403_s15 = sshll.u32 %s1836_s4, 4  ;;  %s1404_s15 = int_to_ptr.vmem [resolvable:$true] %s1403_s15 }
 0x132   :  { %s1799_s16 = scalar_lea.vmem %s1404_s15, 128  ;;  %p1804_p7 = scmp.lt.s32.totalorder %s1404_s15, %s1404_s15 }
 0x133   :  { %1607 = vmatpush3.bf16.msra.mxu0 %v1701_v24  ;;  %1629 = vmatpush3.bf16.msra.mxu1 %v1702_v25  ;;  %p1800_p6 = scmp.ne.s32.totalorder %s1404_s15, %s1799_s16  ;;  %p1805_p8 = scmp.lt.s32.totalorder %s1799_s16, %s1799_s16 }
 0x134   :  { %1608 = vmatprep.subr.bf16.mxu0 %v1703_v26  ;;  %1630 = vmatprep.subr.bf16.mxu1 %v1704_v27 }
 0x135   :  { %p1806_p9 = por %p1805_p8, %p1804_p7 }
 0x137   :  { %1609 = vmatpush3.bf16.msra.mxu0 %v1705_v28  ;;  %1631 = vmatpush3.bf16.msra.mxu1 %v1706_v29  ;;  %p1807_p10 = pnand %p1806_p9, %p1800_p6 }
 0x138   :  { %v629_v37 = vpop.f32.mrf.mxu0  ;;  %1610 = vmatprep.subr.bf16.mxu0 %v1707_v30  ;;  %v672_v41 = vpop.f32.mrf.mxu1  ;;  %1632 = vmatprep.subr.bf16.mxu1 %v1708_v32 }
 0x139   :  { %v630_v56 = vadd.f32 %v629_v37, %v162_v44  ;;  %v673_v60 = vadd.f32 %v672_v41, %v170_v47 }
 0x13a   :  { %v631_v45 = vpop.f32.mrf.mxu0  ;;  %v674_v48 = vpop.f32.mrf.mxu1 }
 0x13b   :  { %1611 = vmatpush3.bf16.msra.mxu0 %v1709_v36  ;;  %1633 = vmatpush3.bf16.msra.mxu1 %v1710_v39  ;;  %v632_v52 = vadd.f32 %v631_v45, %v166_v42  ;;  %v675_v57 = vadd.f32 %v674_v48, %v174_v46  ;;  %v685_v6 = vmax.f32 %v630_v56, 0.0  ;;  %v687_v10 = vmax.f32 %v673_v60, 0.0 }
 0x13c   :  { %v633_v49 = vpop.f32.mrf.mxu0  ;;  %1612 = vmatprep.subr.bf16.mxu0 %v1711_v40  ;;  %v676_v54 = vpop.f32.mrf.mxu1  ;;  %1634 = vmatprep.subr.bf16.mxu1 %v1712_v43 }
 0x13d   :  { %v634_v53 = vadd.f32 %v633_v49, %v162_v44  ;;  %v677_v58 = vadd.f32 %v676_v54, %v170_v47  ;;  %v686_v3 = vmax.f32 %v632_v52, 0.0  ;;  %v688_v8 = vmax.f32 %v675_v57, 0.0 }
 0x13e   :  { %v635_v59 = vpop.f32.mrf.mxu0  ;;  %v678_v0 = vpop.f32.mrf.mxu1 }
 0x13f   :  { %v636_v61 = vadd.f32 %v635_v59, %v166_v42  ;;  %1613 = vmatpush3.bf16.msra.mxu0 %v1713_v38  ;;  %v693_v63 = vmax.f32 %v634_v53, 0.0  ;;  %v679_v1 = vadd.f32 %v678_v0, %v174_v46  ;;  %1635 = vmatpush3.bf16.msra.mxu1 %v1714_v50  ;;  %v695_v4 = vmax.f32 %v677_v58, 0.0 }
 0x140   :  { %1614 = vmatprep.subr.bf16.mxu0 %v1715_v51  ;;  %1636 = vmatprep.subr.bf16.mxu1 %v1716_v55 }
 0x141   :  { %v694_v5 = vmax.f32 %v636_v61, 0.0  ;;  %v696_v9 = vmax.f32 %v679_v1, 0.0  ;;  %v701_v12 = vpack.c.bf16 %v693_v63, %v685_v6  ;;  %v703_v14 = vpack.c.bf16 %v695_v4, %v687_v10 }
 0x143   :  { %v702_v11 = vpack.c.bf16 %v694_v5, %v686_v3  ;;  %1615 = vmatpush3.bf16.msra.mxu0 %v1717_v62  ;;  %v704_v13 = vpack.c.bf16 %v696_v9, %v688_v8  ;;  %1637 = vmatpush3.bf16.msra.mxu1 %v1718_v2 }
 0x145   :  { %1338 = vmatprep.mubr.bf16.mxu0 %v702_v11  ;;  %1379 = vmatprep.mubr.bf16.mxu1 %v704_v13 }
 0x146   :  { %1339 = vmatmul.mubr.bf16.vlgmr.msra.gmra.mxu0 %v701_v12  ;;  %1380 = vmatmul.mubr.bf16.vlgmr.msra.gmra.mxu1 %v703_v14 }
 0x1e6   :  { %v1572_v15 = vpop.f32.mrf.mxu0  ;;  %v1594_v16 = vpop.f32.mrf.mxu1 }
 0x1e8   :  { %v1573_v17 = vpop.f32.mrf.mxu0  ;;  %v1595_v18 = vpop.f32.mrf.mxu1 }
 0x1e9   :  { %v1574_v21 = vadd.f32 %v1573_v17, %v1572_v15  ;;  %v1596_v29 = vadd.f32 %v1595_v18, %v1594_v16 }
 0x1ea   :  { %v1575_v19 = vpop.f32.mrf.mxu0  ;;  %v1597_v20 = vpop.f32.mrf.mxu1 }
 0x1eb   :  { %v1259_v26 = vadd.f32 %v1574_v21, %v1482_v22 }
 0x1ec   :  { %v1576_v7 = vpop.f32.mrf.mxu0  ;;  %v1598_v24 = vpop.f32.mrf.mxu1 }
 0x1ed   :  { %v1577_v23 = vadd.f32 %v1576_v7, %v1575_v19  ;;  %v1300_v34 = vadd.f32 %v1596_v29, %v1259_v26  ;;  %v1599_v35 = vadd.f32 %v1598_v24, %v1597_v20 }
 0x1ef   :  { %v1262_v30 = vadd.f32 %v1577_v23, %v1482_v22 }
 0x1f1   :  { %v1303_v39 = vadd.f32 %v1599_v35, %v1262_v30 }
 0x206   :  { %v1616_v25 = vpop.f32.mrf.mxu0  ;;  %v1638_v27 = vpop.f32.mrf.mxu1 }
 0x208   :  { %v1617_v28 = vpop.f32.mrf.mxu0  ;;  %v1639_v32 = vpop.f32.mrf.mxu1 }
 0x209   :  { %v1618_v31 = vadd.f32 %v1617_v28, %v1616_v25  ;;  %v1640_v43 = vadd.f32 %v1639_v32, %v1638_v27 }
 0x20a   :  { %v1619_v33 = vpop.f32.mrf.mxu0  ;;  %v1641_v36 = vpop.f32.mrf.mxu1 }
 0x20b   :  { %v1341_v40 = vadd.f32 %v1618_v31, %v1300_v34 }
 0x20c   :  { %v1620_v37 = vpop.f32.mrf.mxu0  ;;  %v1642_v42 = vpop.f32.mrf.mxu1 }
 0x20d   :  { %v1621_v41 = vadd.f32 %v1620_v37, %v1619_v33  ;;  %v1643_v45 = vadd.f32 %v1642_v42, %v1641_v36  ;;  %v1382_v46 = vadd.f32 %v1640_v43, %v1341_v40 }
 0x20f   :  { %v1344_v44 = vadd.f32 %v1621_v41, %v1303_v39 }
 0x211   :  { %v1385_v47 = vadd.f32 %v1643_v45, %v1344_v44 }
 0x213   :  { %v1554_v48 = vpack.c.bf16 %v1385_v47, %v1382_v46 }
 0x215   :  { %1555 = vst [vmem:[#allocation10] sm:$0xff] %v1554_v48  }
 0x216   :  { %1810 = shalt.err (!%p1807_p10)
}
 0x217   :  { %1409 = dma.vmem_to_hbm [thread:$0]  %s1404_s15, 128, %s1929_s5, [#allocation4], %s1831_s28, %s1831_s28, %s1832_s29  }
 0x218   :  { %1825 = dma.done.wait [#allocation4], 128  }
 0x219   :  { %1826 = vsyncadd [#allocation4], 4294967168 }
 0x21a   :  { %1413 = vsyncpa [#allocation3], 1 }
 0x21b   :  { %1414 = vsyncpa [#allocation6], 1 }
 0x21c   :  { %1415 = vsyncpa [#allocation9], 1 }
 0x21d   :  { %1416 = vsyncpa [#allocation4], 1 }

</bundles_post_ra>
